<compile_context>
chip_gen: v6e
topology: v6e:2x2x1
jax: 0.10.0
libtpu: 0.0.40
codegen_flags: <defaults>
</compile_context>

<pallas_src>
import jax
import jax.numpy as jnp
from jax.experimental import pallas as pl
from jax.experimental.pallas import tpu as pltpu


def _make_conv_sigmoid_kernel(c_in, c_out, ksize, h, w, tn):
    """Builds the per-block kernel: 'same' KxK conv (stride 1, no bias) + sigmoid.

    Block layouts:
      w_ref : SMEM (c_out*c_in*ksize*ksize,) float32, PyTorch OIHW order, flattened
      x_ref : VMEM (c_in, tn, hw + 2*padl)   input, HW flattened on lanes, pre-padded
      o_ref : VMEM (c_out, tn, hw)           output, HW flattened on lanes
    """
    hw = h * w
    half = ksize // 2
    padl = half * (w + 1)   # covers the most negative / positive flattened shift

    def kernel(w_ref, x_ref, o_ref):
        # Column index of every flattened pixel (hoisted out of all loops).
        col = jax.lax.broadcasted_iota(jnp.int32, (1, hw), 1) % w
        col_masks = {}
        for dw in range(-half, half + 1):
            if dw < 0:
                col_masks[dw] = col >= (-dw)
            elif dw > 0:
                col_masks[dw] = col < (w - dw)
            else:
                col_masks[dw] = None

        accs = [jnp.zeros((tn, hw), dtype=jnp.float32) for _ in range(c_out)]

        for ci in range(c_in):
            xc = x_ref[ci].astype(jnp.float32)            # (tn, hw + 2*padl), lane-dense
            for dh in range(-half, half + 1):
                for dw in range(-half, half + 1):
                    shift = dh * w + dw
                    start = padl + shift
                    s = xc[:, start:start + hw]            # static lane slice
                    m = col_masks[dw]
                    if m is not None:
                        # kill horizontal wrap-around across image rows
                        s = jnp.where(m, s, 0.0)
                    for co in range(c_out):
                        widx = ((co * c_in + ci) * ksize + (dh + half)) * ksize + (dw + half)
                        accs[co] = accs[co] + w_ref[widx] * s

        for co in range(c_out):
            y = 1.0 / (1.0 + jnp.exp(-accs[co]))           # sigmoid
            o_ref[co] = y.astype(o_ref.dtype)

    return kernel


def _pick_image_tile(n, c_in, hw_padded, itemsize):
    """Images per grid step: sublane-aligned, VMEM-friendly, >=2 grid steps if possible."""
    n8 = max(8, ((n + 7) // 8) * 8)
    # Keep the (double-buffered) input block comfortably inside v5e's 16 MiB scoped
    # VMEM default and v7x's smaller 64 MiB VMEM: ~4 MiB budget for one input block.
    cap = max(8, (4 * 1024 * 1024) // max(1, c_in * hw_padded * itemsize))
    cap = max(8, (cap // 8) * 8)
    tn = min(256, n8, cap)
    # v7x has 2 TensorCores: keep at least 2 grid steps when there is enough work.
    if n8 // tn < 2 and n8 >= 16:
        tn = max(8, ((n8 // 2) // 8) * 8)
    n_pad = ((n8 + tn - 1) // tn) * tn
    return tn, n_pad


def time_distributed_sigmoid(x, weight):
    """Pallas forward of TimeDistributedSigmoid.

    x      : (B, T, C_in, H, W)
    weight : (C_out, C_in, K, K)  (PyTorch Conv2d OIHW; K odd, stride 1, padding K//2, no bias)
    returns: (B, T, C_out, H, W)
    """
    if x.ndim != 5:
        raise ValueError(
            f"TimeDistributedSigmoid expects a 5-D (B, T, C, H, W) input, got {x.shape}")
    b, t, c_in, h, w = x.shape
    if weight.ndim != 4 or weight.shape[1] != c_in or weight.shape[2] != weight.shape[3]:
        raise ValueError(f"weight must be (C_out, {c_in}, K, K), got {weight.shape}")
    c_out, _, ksize, _ = weight.shape
    if ksize % 2 != 1 or ksize >= 2 * min(h, w):
        raise ValueError("only odd kernel sizes smaller than the image are supported")
    # TODO(synk): stride != 1, padding != K//2 and conv bias are not implemented
    # (the module defaults kernel_size=3, stride=1, padding=1, bias=False are covered).

    n = b * t
    hw = h * w
    half = ksize // 2
    padl = half * (w + 1)
    hw_padded = hw + 2 * padl

    tn, n_pad = _pick_image_tile(n, c_in, hw_padded, x.dtype.itemsize)

    # Layout plumbing (outside the kernel): flatten (H, W) onto the lane axis, put
    # channels in front so the kernel reads dense (TN, HW) slabs, pre-apply the
    # 'same' zero padding on the flattened axis, and pad N up to the tile size.
    xf = x.reshape(n, c_in, hw).transpose(1, 0, 2)                 # (C, N, HW)
    xf = jnp.pad(xf, ((0, 0), (0, n_pad - n), (padl, padl)))       # (C, Np, HWp)

    w_flat = weight.astype(jnp.float32).reshape(-1)                # (C_out*C_in*K*K,)

    kernel = _make_conv_sigmoid_kernel(c_in, c_out, ksize, h, w, tn)
    num_blocks = n_pad // tn

    out = pl.pallas_call(
        kernel,
        out_shape=jax.ShapeDtypeStruct((c_out, n_pad, hw), x.dtype),
        grid=(num_blocks,),
        in_specs=[
            pl.BlockSpec(memory_space=pltpu.MemorySpace.SMEM),           # conv weights
            pl.BlockSpec((c_in, tn, hw_padded), lambda i: (0, i, 0)),    # image batch
        ],
        out_specs=pl.BlockSpec((c_out, tn, hw), lambda i: (0, i, 0)),
        compiler_params=pltpu.CompilerParams(dimension_semantics=("parallel",)),
    )(w_flat, xf)

    out = out.transpose(1, 0, 2)[:n]                               # (N, C_out, HW)
    return out.reshape(b, t, c_out, h, w)


if __name__ == "__main__":
    # Small shapes implied by the module: batch=2, seq=8, in_channels=4, spatial=16,
    # out_channels=1, kernel_size=3 (module defaults).
    B, T, C, H, W = 2, 8, 4, 16, 16
    C_OUT, K = 1, 3

    key = jax.random.PRNGKey(0)
    kx, kw = jax.random.split(key)
    x = jax.random.normal(kx, (B, T, C, H, W), dtype=jnp.float32)
    weight = jax.random.normal(kw, (C_OUT, C, K, K), dtype=jnp.float32) * 0.2

    y = time_distributed_sigmoid(x, weight)
    y = jax.block_until_ready(y)

    # Pure-JAX reference: Conv2d (cross-correlation, padding=1, no bias) + sigmoid.
    xf = x.reshape(B * T, C, H, W)
    conv = jax.lax.conv_general_dilated(
        xf, weight, window_strides=(1, 1), padding=((K // 2, K // 2), (K // 2, K // 2)),
        dimension_numbers=("NCHW", "OIHW", "NCHW"))
    y_ref = (1.0 / (1.0 + jnp.exp(-conv))).reshape(B, T, C_OUT, H, W)

    assert y.shape == (B, T, C_OUT, H, W), y.shape
    assert y.dtype == x.dtype
    assert jnp.allclose(y, y_ref, atol=1e-5, rtol=1e-5), float(jnp.max(jnp.abs(y - y_ref)))

    print("KERNEL_OK")
</pallas_src>

<mosaic_0001>
module attributes {stable_mosaic.version = 11 : i64} {
  func.func @kernel(%arg0: i32, %arg1: memref<36xf32, #tpu.memory_space<smem>>, %arg2: memref<4x8x290xf32, #tpu.memory_space<vmem>>, %arg3: memref<1x8x256xf32, #tpu.memory_space<vmem>>) attributes {dimension_semantics = [#tpu.dimension_semantics<parallel>], iteration_bounds = array<i64: 2>, scalar_prefetch = 0 : i64, scratch_operands = 0 : i64, tpu.core_type = #tpu.core_type<tc>, window_params = [{transform_indices = @transform_0, window_bounds = array<i64: 36>}, {transform_indices = @transform_1, window_bounds = array<i64: 4, 8, 290>}, {transform_indices = @transform_2, window_bounds = array<i64: 1, 8, 256>}]} {
    %0 = tpu.iota {dimensions = array<i32: 1>} : vector<1x256xi32>
    %c16_i32 = arith.constant 16 : i32
    %c0_i32 = arith.constant 0 : i32
    %1 = arith.cmpi eq, %c16_i32, %c0_i32 : i32
    %c1_i32 = arith.constant 1 : i32
    %2 = arith.select %1, %c1_i32, %c16_i32 : i32
    %3 = vector.broadcast %2 : i32 to vector<1x256xi32>
    %4 = arith.remsi %0, %3 : vector<1x256xi32>
    %c0_i32_0 = arith.constant 0 : i32
    %5 = vector.broadcast %c0_i32_0 : i32 to vector<1x256xi32>
    %6 = arith.cmpi ne, %4, %5 : vector<1x256xi32>
    %c0_i32_1 = arith.constant 0 : i32
    %7 = vector.broadcast %c0_i32_1 : i32 to vector<1x256xi32>
    %8 = arith.cmpi slt, %4, %7 : vector<1x256xi32>
    %c0_i32_2 = arith.constant 0 : i32
    %9 = arith.cmpi slt, %2, %c0_i32_2 : i32
    %10 = vector.broadcast %9 : i1 to vector<1x256xi1>
    %11 = vector.broadcast %10 : vector<1x256xi1> to vector<1x256xi1>
    %12 = arith.xori %8, %11 : vector<1x256xi1>
    %13 = arith.andi %12, %6 : vector<1x256xi1>
    %14 = vector.broadcast %2 : i32 to vector<1x256xi32>
    %15 = arith.addi %4, %14 : vector<1x256xi32>
    %16 = arith.select %13, %15, %4 : vector<1x256xi1>, vector<1x256xi32>
    %c1_i32_3 = arith.constant 1 : i32
    %17 = vector.broadcast %c1_i32_3 : i32 to vector<1x256xi32>
    %18 = arith.cmpi sge, %16, %17 : vector<1x256xi32>
    %c15_i32 = arith.constant 15 : i32
    %19 = vector.broadcast %c15_i32 : i32 to vector<1x256xi32>
    %20 = arith.cmpi slt, %16, %19 : vector<1x256xi32>
    %cst = arith.constant 0.000000e+00 : f32
    %21 = vector.broadcast %cst : f32 to vector<8x256xf32>
    %c0 = arith.constant 0 : index
    %c0_4 = arith.constant 0 : index
    %c0_5 = arith.constant 0 : index
    %22 = vector.load %arg2[%c0, %c0_4, %c0_5] : memref<4x8x290xf32, #tpu.memory_space<vmem>>, vector<1x8x290xf32>
    %23 = vector.shape_cast %22 : vector<1x8x290xf32> to vector<8x290xf32>
    %24 = vector.extract_strided_slice %23 {offsets = [0, 0], sizes = [8, 256], strides = [1, 1]} : vector<8x290xf32> to vector<8x256xf32>
    %cst_6 = arith.constant 0.000000e+00 : f32
    %25 = vector.shape_cast %18 : vector<1x256xi1> to vector<1x256xi1>
    %26 = vector.broadcast %25 : vector<1x256xi1> to vector<8x256xi1>
    %27 = vector.broadcast %cst_6 : f32 to vector<8x256xf32>
    %28 = arith.select %26, %24, %27 : vector<8x256xi1>, vector<8x256xf32>
    %c0_7 = arith.constant 0 : index
    %29 = memref.load %arg1[%c0_7] : memref<36xf32, #tpu.memory_space<smem>>
    %30 = vector.broadcast %29 : f32 to vector<8x256xf32>
    %31 = arith.mulf %30, %28 : vector<8x256xf32>
    %32 = arith.addf %21, %31 : vector<8x256xf32>
    %33 = vector.extract_strided_slice %23 {offsets = [0, 1], sizes = [8, 256], strides = [1, 1]} : vector<8x290xf32> to vector<8x256xf32>
    %c1 = arith.constant 1 : index
    %34 = memref.load %arg1[%c1] : memref<36xf32, #tpu.memory_space<smem>>
    %35 = vector.broadcast %34 : f32 to vector<8x256xf32>
    %36 = arith.mulf %35, %33 : vector<8x256xf32>
    %37 = arith.addf %32, %36 : vector<8x256xf32>
    %38 = vector.extract_strided_slice %23 {offsets = [0, 2], sizes = [8, 256], strides = [1, 1]} : vector<8x290xf32> to vector<8x256xf32>
    %cst_8 = arith.constant 0.000000e+00 : f32
    %39 = vector.shape_cast %20 : vector<1x256xi1> to vector<1x256xi1>
    %40 = vector.broadcast %39 : vector<1x256xi1> to vector<8x256xi1>
    %41 = vector.broadcast %cst_8 : f32 to vector<8x256xf32>
    %42 = arith.select %40, %38, %41 : vector<8x256xi1>, vector<8x256xf32>
    %c2 = arith.constant 2 : index
    %43 = memref.load %arg1[%c2] : memref<36xf32, #tpu.memory_space<smem>>
    %44 = vector.broadcast %43 : f32 to vector<8x256xf32>
    %45 = arith.mulf %44, %42 : vector<8x256xf32>
    %46 = arith.addf %37, %45 : vector<8x256xf32>
    %47 = vector.extract_strided_slice %23 {offsets = [0, 16], sizes = [8, 256], strides = [1, 1]} : vector<8x290xf32> to vector<8x256xf32>
    %cst_9 = arith.constant 0.000000e+00 : f32
    %48 = vector.shape_cast %18 : vector<1x256xi1> to vector<1x256xi1>
    %49 = vector.broadcast %48 : vector<1x256xi1> to vector<8x256xi1>
    %50 = vector.broadcast %cst_9 : f32 to vector<8x256xf32>
    %51 = arith.select %49, %47, %50 : vector<8x256xi1>, vector<8x256xf32>
    %c3 = arith.constant 3 : index
    %52 = memref.load %arg1[%c3] : memref<36xf32, #tpu.memory_space<smem>>
    %53 = vector.broadcast %52 : f32 to vector<8x256xf32>
    %54 = arith.mulf %53, %51 : vector<8x256xf32>
    %55 = arith.addf %46, %54 : vector<8x256xf32>
    %56 = vector.extract_strided_slice %23 {offsets = [0, 17], sizes = [8, 256], strides = [1, 1]} : vector<8x290xf32> to vector<8x256xf32>
    %c4 = arith.constant 4 : index
    %57 = memref.load %arg1[%c4] : memref<36xf32, #tpu.memory_space<smem>>
    %58 = vector.broadcast %57 : f32 to vector<8x256xf32>
    %59 = arith.mulf %58, %56 : vector<8x256xf32>
    %60 = arith.addf %55, %59 : vector<8x256xf32>
    %61 = vector.extract_strided_slice %23 {offsets = [0, 18], sizes = [8, 256], strides = [1, 1]} : vector<8x290xf32> to vector<8x256xf32>
    %cst_10 = arith.constant 0.000000e+00 : f32
    %62 = vector.shape_cast %20 : vector<1x256xi1> to vector<1x256xi1>
    %63 = vector.broadcast %62 : vector<1x256xi1> to vector<8x256xi1>
    %64 = vector.broadcast %cst_10 : f32 to vector<8x256xf32>
    %65 = arith.select %63, %61, %64 : vector<8x256xi1>, vector<8x256xf32>
    %c5 = arith.constant 5 : index
    %66 = memref.load %arg1[%c5] : memref<36xf32, #tpu.memory_space<smem>>
    %67 = vector.broadcast %66 : f32 to vector<8x256xf32>
    %68 = arith.mulf %67, %65 : vector<8x256xf32>
    %69 = arith.addf %60, %68 : vector<8x256xf32>
    %70 = vector.extract_strided_slice %23 {offsets = [0, 32], sizes = [8, 256], strides = [1, 1]} : vector<8x290xf32> to vector<8x256xf32>
    %cst_11 = arith.constant 0.000000e+00 : f32
    %71 = vector.shape_cast %18 : vector<1x256xi1> to vector<1x256xi1>
    %72 = vector.broadcast %71 : vector<1x256xi1> to vector<8x256xi1>
    %73 = vector.broadcast %cst_11 : f32 to vector<8x256xf32>
    %74 = arith.select %72, %70, %73 : vector<8x256xi1>, vector<8x256xf32>
    %c6 = arith.constant 6 : index
    %75 = memref.load %arg1[%c6] : memref<36xf32, #tpu.memory_space<smem>>
    %76 = vector.broadcast %75 : f32 to vector<8x256xf32>
    %77 = arith.mulf %76, %74 : vector<8x256xf32>
    %78 = arith.addf %69, %77 : vector<8x256xf32>
    %79 = vector.extract_strided_slice %23 {offsets = [0, 33], sizes = [8, 256], strides = [1, 1]} : vector<8x290xf32> to vector<8x256xf32>
    %c7 = arith.constant 7 : index
    %80 = memref.load %arg1[%c7] : memref<36xf32, #tpu.memory_space<smem>>
    %81 = vector.broadcast %80 : f32 to vector<8x256xf32>
    %82 = arith.mulf %81, %79 : vector<8x256xf32>
    %83 = arith.addf %78, %82 : vector<8x256xf32>
    %84 = vector.extract_strided_slice %23 {offsets = [0, 34], sizes = [8, 256], strides = [1, 1]} : vector<8x290xf32> to vector<8x256xf32>
    %cst_12 = arith.constant 0.000000e+00 : f32
    %85 = vector.shape_cast %20 : vector<1x256xi1> to vector<1x256xi1>
    %86 = vector.broadcast %85 : vector<1x256xi1> to vector<8x256xi1>
    %87 = vector.broadcast %cst_12 : f32 to vector<8x256xf32>
    %88 = arith.select %86, %84, %87 : vector<8x256xi1>, vector<8x256xf32>
    %c8 = arith.constant 8 : index
    %89 = memref.load %arg1[%c8] : memref<36xf32, #tpu.memory_space<smem>>
    %90 = vector.broadcast %89 : f32 to vector<8x256xf32>
    %91 = arith.mulf %90, %88 : vector<8x256xf32>
    %92 = arith.addf %83, %91 : vector<8x256xf32>
    %c1_13 = arith.constant 1 : index
    %c0_14 = arith.constant 0 : index
    %c0_15 = arith.constant 0 : index
    %93 = vector.load %arg2[%c1_13, %c0_14, %c0_15] : memref<4x8x290xf32, #tpu.memory_space<vmem>>, vector<1x8x290xf32>
    %94 = vector.shape_cast %93 : vector<1x8x290xf32> to vector<8x290xf32>
    %95 = vector.extract_strided_slice %94 {offsets = [0, 0], sizes = [8, 256], strides = [1, 1]} : vector<8x290xf32> to vector<8x256xf32>
    %cst_16 = arith.constant 0.000000e+00 : f32
    %96 = vector.shape_cast %18 : vector<1x256xi1> to vector<1x256xi1>
    %97 = vector.broadcast %96 : vector<1x256xi1> to vector<8x256xi1>
    %98 = vector.broadcast %cst_16 : f32 to vector<8x256xf32>
    %99 = arith.select %97, %95, %98 : vector<8x256xi1>, vector<8x256xf32>
    %c9 = arith.constant 9 : index
    %100 = memref.load %arg1[%c9] : memref<36xf32, #tpu.memory_space<smem>>
    %101 = vector.broadcast %100 : f32 to vector<8x256xf32>
    %102 = arith.mulf %101, %99 : vector<8x256xf32>
    %103 = arith.addf %92, %102 : vector<8x256xf32>
    %104 = vector.extract_strided_slice %94 {offsets = [0, 1], sizes = [8, 256], strides = [1, 1]} : vector<8x290xf32> to vector<8x256xf32>
    %c10 = arith.constant 10 : index
    %105 = memref.load %arg1[%c10] : memref<36xf32, #tpu.memory_space<smem>>
    %106 = vector.broadcast %105 : f32 to vector<8x256xf32>
    %107 = arith.mulf %106, %104 : vector<8x256xf32>
    %108 = arith.addf %103, %107 : vector<8x256xf32>
    %109 = vector.extract_strided_slice %94 {offsets = [0, 2], sizes = [8, 256], strides = [1, 1]} : vector<8x290xf32> to vector<8x256xf32>
    %cst_17 = arith.constant 0.000000e+00 : f32
    %110 = vector.shape_cast %20 : vector<1x256xi1> to vector<1x256xi1>
    %111 = vector.broadcast %110 : vector<1x256xi1> to vector<8x256xi1>
    %112 = vector.broadcast %cst_17 : f32 to vector<8x256xf32>
    %113 = arith.select %111, %109, %112 : vector<8x256xi1>, vector<8x256xf32>
    %c11 = arith.constant 11 : index
    %114 = memref.load %arg1[%c11] : memref<36xf32, #tpu.memory_space<smem>>
    %115 = vector.broadcast %114 : f32 to vector<8x256xf32>
    %116 = arith.mulf %115, %113 : vector<8x256xf32>
    %117 = arith.addf %108, %116 : vector<8x256xf32>
    %118 = vector.extract_strided_slice %94 {offsets = [0, 16], sizes = [8, 256], strides = [1, 1]} : vector<8x290xf32> to vector<8x256xf32>
    %cst_18 = arith.constant 0.000000e+00 : f32
    %119 = vector.shape_cast %18 : vector<1x256xi1> to vector<1x256xi1>
    %120 = vector.broadcast %119 : vector<1x256xi1> to vector<8x256xi1>
    %121 = vector.broadcast %cst_18 : f32 to vector<8x256xf32>
    %122 = arith.select %120, %118, %121 : vector<8x256xi1>, vector<8x256xf32>
    %c12 = arith.constant 12 : index
    %123 = memref.load %arg1[%c12] : memref<36xf32, #tpu.memory_space<smem>>
    %124 = vector.broadcast %123 : f32 to vector<8x256xf32>
    %125 = arith.mulf %124, %122 : vector<8x256xf32>
    %126 = arith.addf %117, %125 : vector<8x256xf32>
    %127 = vector.extract_strided_slice %94 {offsets = [0, 17], sizes = [8, 256], strides = [1, 1]} : vector<8x290xf32> to vector<8x256xf32>
    %c13 = arith.constant 13 : index
    %128 = memref.load %arg1[%c13] : memref<36xf32, #tpu.memory_space<smem>>
    %129 = vector.broadcast %128 : f32 to vector<8x256xf32>
    %130 = arith.mulf %129, %127 : vector<8x256xf32>
    %131 = arith.addf %126, %130 : vector<8x256xf32>
    %132 = vector.extract_strided_slice %94 {offsets = [0, 18], sizes = [8, 256], strides = [1, 1]} : vector<8x290xf32> to vector<8x256xf32>
    %cst_19 = arith.constant 0.000000e+00 : f32
    %133 = vector.shape_cast %20 : vector<1x256xi1> to vector<1x256xi1>
    %134 = vector.broadcast %133 : vector<1x256xi1> to vector<8x256xi1>
    %135 = vector.broadcast %cst_19 : f32 to vector<8x256xf32>
    %136 = arith.select %134, %132, %135 : vector<8x256xi1>, vector<8x256xf32>
    %c14 = arith.constant 14 : index
    %137 = memref.load %arg1[%c14] : memref<36xf32, #tpu.memory_space<smem>>
    %138 = vector.broadcast %137 : f32 to vector<8x256xf32>
    %139 = arith.mulf %138, %136 : vector<8x256xf32>
    %140 = arith.addf %131, %139 : vector<8x256xf32>
    %141 = vector.extract_strided_slice %94 {offsets = [0, 32], sizes = [8, 256], strides = [1, 1]} : vector<8x290xf32> to vector<8x256xf32>
    %cst_20 = arith.constant 0.000000e+00 : f32
    %142 = vector.shape_cast %18 : vector<1x256xi1> to vector<1x256xi1>
    %143 = vector.broadcast %142 : vector<1x256xi1> to vector<8x256xi1>
    %144 = vector.broadcast %cst_20 : f32 to vector<8x256xf32>
    %145 = arith.select %143, %141, %144 : vector<8x256xi1>, vector<8x256xf32>
    %c15 = arith.constant 15 : index
    %146 = memref.load %arg1[%c15] : memref<36xf32, #tpu.memory_space<smem>>
    %147 = vector.broadcast %146 : f32 to vector<8x256xf32>
    %148 = arith.mulf %147, %145 : vector<8x256xf32>
    %149 = arith.addf %140, %148 : vector<8x256xf32>
    %150 = vector.extract_strided_slice %94 {offsets = [0, 33], sizes = [8, 256], strides = [1, 1]} : vector<8x290xf32> to vector<8x256xf32>
    %c16 = arith.constant 16 : index
    %151 = memref.load %arg1[%c16] : memref<36xf32, #tpu.memory_space<smem>>
    %152 = vector.broadcast %151 : f32 to vector<8x256xf32>
    %153 = arith.mulf %152, %150 : vector<8x256xf32>
    %154 = arith.addf %149, %153 : vector<8x256xf32>
    %155 = vector.extract_strided_slice %94 {offsets = [0, 34], sizes = [8, 256], strides = [1, 1]} : vector<8x290xf32> to vector<8x256xf32>
    %cst_21 = arith.constant 0.000000e+00 : f32
    %156 = vector.shape_cast %20 : vector<1x256xi1> to vector<1x256xi1>
    %157 = vector.broadcast %156 : vector<1x256xi1> to vector<8x256xi1>
    %158 = vector.broadcast %cst_21 : f32 to vector<8x256xf32>
    %159 = arith.select %157, %155, %158 : vector<8x256xi1>, vector<8x256xf32>
    %c17 = arith.constant 17 : index
    %160 = memref.load %arg1[%c17] : memref<36xf32, #tpu.memory_space<smem>>
    %161 = vector.broadcast %160 : f32 to vector<8x256xf32>
    %162 = arith.mulf %161, %159 : vector<8x256xf32>
    %163 = arith.addf %154, %162 : vector<8x256xf32>
    %c2_22 = arith.constant 2 : index
    %c0_23 = arith.constant 0 : index
    %c0_24 = arith.constant 0 : index
    %164 = vector.load %arg2[%c2_22, %c0_23, %c0_24] : memref<4x8x290xf32, #tpu.memory_space<vmem>>, vector<1x8x290xf32>
    %165 = vector.shape_cast %164 : vector<1x8x290xf32> to vector<8x290xf32>
    %166 = vector.extract_strided_slice %165 {offsets = [0, 0], sizes = [8, 256], strides = [1, 1]} : vector<8x290xf32> to vector<8x256xf32>
    %cst_25 = arith.constant 0.000000e+00 : f32
    %167 = vector.shape_cast %18 : vector<1x256xi1> to vector<1x256xi1>
    %168 = vector.broadcast %167 : vector<1x256xi1> to vector<8x256xi1>
    %169 = vector.broadcast %cst_25 : f32 to vector<8x256xf32>
    %170 = arith.select %168, %166, %169 : vector<8x256xi1>, vector<8x256xf32>
    %c18 = arith.constant 18 : index
    %171 = memref.load %arg1[%c18] : memref<36xf32, #tpu.memory_space<smem>>
    %172 = vector.broadcast %171 : f32 to vector<8x256xf32>
    %173 = arith.mulf %172, %170 : vector<8x256xf32>
    %174 = arith.addf %163, %173 : vector<8x256xf32>
    %175 = vector.extract_strided_slice %165 {offsets = [0, 1], sizes = [8, 256], strides = [1, 1]} : vector<8x290xf32> to vector<8x256xf32>
    %c19 = arith.constant 19 : index
    %176 = memref.load %arg1[%c19] : memref<36xf32, #tpu.memory_space<smem>>
    %177 = vector.broadcast %176 : f32 to vector<8x256xf32>
    %178 = arith.mulf %177, %175 : vector<8x256xf32>
    %179 = arith.addf %174, %178 : vector<8x256xf32>
    %180 = vector.extract_strided_slice %165 {offsets = [0, 2], sizes = [8, 256], strides = [1, 1]} : vector<8x290xf32> to vector<8x256xf32>
    %cst_26 = arith.constant 0.000000e+00 : f32
    %181 = vector.shape_cast %20 : vector<1x256xi1> to vector<1x256xi1>
    %182 = vector.broadcast %181 : vector<1x256xi1> to vector<8x256xi1>
    %183 = vector.broadcast %cst_26 : f32 to vector<8x256xf32>
    %184 = arith.select %182, %180, %183 : vector<8x256xi1>, vector<8x256xf32>
    %c20 = arith.constant 20 : index
    %185 = memref.load %arg1[%c20] : memref<36xf32, #tpu.memory_space<smem>>
    %186 = vector.broadcast %185 : f32 to vector<8x256xf32>
    %187 = arith.mulf %186, %184 : vector<8x256xf32>
    %188 = arith.addf %179, %187 : vector<8x256xf32>
    %189 = vector.extract_strided_slice %165 {offsets = [0, 16], sizes = [8, 256], strides = [1, 1]} : vector<8x290xf32> to vector<8x256xf32>
    %cst_27 = arith.constant 0.000000e+00 : f32
    %190 = vector.shape_cast %18 : vector<1x256xi1> to vector<1x256xi1>
    %191 = vector.broadcast %190 : vector<1x256xi1> to vector<8x256xi1>
    %192 = vector.broadcast %cst_27 : f32 to vector<8x256xf32>
    %193 = arith.select %191, %189, %192 : vector<8x256xi1>, vector<8x256xf32>
    %c21 = arith.constant 21 : index
    %194 = memref.load %arg1[%c21] : memref<36xf32, #tpu.memory_space<smem>>
    %195 = vector.broadcast %194 : f32 to vector<8x256xf32>
    %196 = arith.mulf %195, %193 : vector<8x256xf32>
    %197 = arith.addf %188, %196 : vector<8x256xf32>
    %198 = vector.extract_strided_slice %165 {offsets = [0, 17], sizes = [8, 256], strides = [1, 1]} : vector<8x290xf32> to vector<8x256xf32>
    %c22 = arith.constant 22 : index
    %199 = memref.load %arg1[%c22] : memref<36xf32, #tpu.memory_space<smem>>
    %200 = vector.broadcast %199 : f32 to vector<8x256xf32>
    %201 = arith.mulf %200, %198 : vector<8x256xf32>
    %202 = arith.addf %197, %201 : vector<8x256xf32>
    %203 = vector.extract_strided_slice %165 {offsets = [0, 18], sizes = [8, 256], strides = [1, 1]} : vector<8x290xf32> to vector<8x256xf32>
    %cst_28 = arith.constant 0.000000e+00 : f32
    %204 = vector.shape_cast %20 : vector<1x256xi1> to vector<1x256xi1>
    %205 = vector.broadcast %204 : vector<1x256xi1> to vector<8x256xi1>
    %206 = vector.broadcast %cst_28 : f32 to vector<8x256xf32>
    %207 = arith.select %205, %203, %206 : vector<8x256xi1>, vector<8x256xf32>
    %c23 = arith.constant 23 : index
    %208 = memref.load %arg1[%c23] : memref<36xf32, #tpu.memory_space<smem>>
    %209 = vector.broadcast %208 : f32 to vector<8x256xf32>
    %210 = arith.mulf %209, %207 : vector<8x256xf32>
    %211 = arith.addf %202, %210 : vector<8x256xf32>
    %212 = vector.extract_strided_slice %165 {offsets = [0, 32], sizes = [8, 256], strides = [1, 1]} : vector<8x290xf32> to vector<8x256xf32>
    %cst_29 = arith.constant 0.000000e+00 : f32
    %213 = vector.shape_cast %18 : vector<1x256xi1> to vector<1x256xi1>
    %214 = vector.broadcast %213 : vector<1x256xi1> to vector<8x256xi1>
    %215 = vector.broadcast %cst_29 : f32 to vector<8x256xf32>
    %216 = arith.select %214, %212, %215 : vector<8x256xi1>, vector<8x256xf32>
    %c24 = arith.constant 24 : index
    %217 = memref.load %arg1[%c24] : memref<36xf32, #tpu.memory_space<smem>>
    %218 = vector.broadcast %217 : f32 to vector<8x256xf32>
    %219 = arith.mulf %218, %216 : vector<8x256xf32>
    %220 = arith.addf %211, %219 : vector<8x256xf32>
    %221 = vector.extract_strided_slice %165 {offsets = [0, 33], sizes = [8, 256], strides = [1, 1]} : vector<8x290xf32> to vector<8x256xf32>
    %c25 = arith.constant 25 : index
    %222 = memref.load %arg1[%c25] : memref<36xf32, #tpu.memory_space<smem>>
    %223 = vector.broadcast %222 : f32 to vector<8x256xf32>
    %224 = arith.mulf %223, %221 : vector<8x256xf32>
    %225 = arith.addf %220, %224 : vector<8x256xf32>
    %226 = vector.extract_strided_slice %165 {offsets = [0, 34], sizes = [8, 256], strides = [1, 1]} : vector<8x290xf32> to vector<8x256xf32>
    %cst_30 = arith.constant 0.000000e+00 : f32
    %227 = vector.shape_cast %20 : vector<1x256xi1> to vector<1x256xi1>
    %228 = vector.broadcast %227 : vector<1x256xi1> to vector<8x256xi1>
    %229 = vector.broadcast %cst_30 : f32 to vector<8x256xf32>
    %230 = arith.select %228, %226, %229 : vector<8x256xi1>, vector<8x256xf32>
    %c26 = arith.constant 26 : index
    %231 = memref.load %arg1[%c26] : memref<36xf32, #tpu.memory_space<smem>>
    %232 = vector.broadcast %231 : f32 to vector<8x256xf32>
    %233 = arith.mulf %232, %230 : vector<8x256xf32>
    %234 = arith.addf %225, %233 : vector<8x256xf32>
    %c3_31 = arith.constant 3 : index
    %c0_32 = arith.constant 0 : index
    %c0_33 = arith.constant 0 : index
    %235 = vector.load %arg2[%c3_31, %c0_32, %c0_33] : memref<4x8x290xf32, #tpu.memory_space<vmem>>, vector<1x8x290xf32>
    %236 = vector.shape_cast %235 : vector<1x8x290xf32> to vector<8x290xf32>
    %237 = vector.extract_strided_slice %236 {offsets = [0, 0], sizes = [8, 256], strides = [1, 1]} : vector<8x290xf32> to vector<8x256xf32>
    %cst_34 = arith.constant 0.000000e+00 : f32
    %238 = vector.shape_cast %18 : vector<1x256xi1> to vector<1x256xi1>
    %239 = vector.broadcast %238 : vector<1x256xi1> to vector<8x256xi1>
    %240 = vector.broadcast %cst_34 : f32 to vector<8x256xf32>
    %241 = arith.select %239, %237, %240 : vector<8x256xi1>, vector<8x256xf32>
    %c27 = arith.constant 27 : index
    %242 = memref.load %arg1[%c27] : memref<36xf32, #tpu.memory_space<smem>>
    %243 = vector.broadcast %242 : f32 to vector<8x256xf32>
    %244 = arith.mulf %243, %241 : vector<8x256xf32>
    %245 = arith.addf %234, %244 : vector<8x256xf32>
    %246 = vector.extract_strided_slice %236 {offsets = [0, 1], sizes = [8, 256], strides = [1, 1]} : vector<8x290xf32> to vector<8x256xf32>
    %c28 = arith.constant 28 : index
    %247 = memref.load %arg1[%c28] : memref<36xf32, #tpu.memory_space<smem>>
    %248 = vector.broadcast %247 : f32 to vector<8x256xf32>
    %249 = arith.mulf %248, %246 : vector<8x256xf32>
    %250 = arith.addf %245, %249 : vector<8x256xf32>
    %251 = vector.extract_strided_slice %236 {offsets = [0, 2], sizes = [8, 256], strides = [1, 1]} : vector<8x290xf32> to vector<8x256xf32>
    %cst_35 = arith.constant 0.000000e+00 : f32
    %252 = vector.shape_cast %20 : vector<1x256xi1> to vector<1x256xi1>
    %253 = vector.broadcast %252 : vector<1x256xi1> to vector<8x256xi1>
    %254 = vector.broadcast %cst_35 : f32 to vector<8x256xf32>
    %255 = arith.select %253, %251, %254 : vector<8x256xi1>, vector<8x256xf32>
    %c29 = arith.constant 29 : index
    %256 = memref.load %arg1[%c29] : memref<36xf32, #tpu.memory_space<smem>>
    %257 = vector.broadcast %256 : f32 to vector<8x256xf32>
    %258 = arith.mulf %257, %255 : vector<8x256xf32>
    %259 = arith.addf %250, %258 : vector<8x256xf32>
    %260 = vector.extract_strided_slice %236 {offsets = [0, 16], sizes = [8, 256], strides = [1, 1]} : vector<8x290xf32> to vector<8x256xf32>
    %cst_36 = arith.constant 0.000000e+00 : f32
    %261 = vector.shape_cast %18 : vector<1x256xi1> to vector<1x256xi1>
    %262 = vector.broadcast %261 : vector<1x256xi1> to vector<8x256xi1>
    %263 = vector.broadcast %cst_36 : f32 to vector<8x256xf32>
    %264 = arith.select %262, %260, %263 : vector<8x256xi1>, vector<8x256xf32>
    %c30 = arith.constant 30 : index
    %265 = memref.load %arg1[%c30] : memref<36xf32, #tpu.memory_space<smem>>
    %266 = vector.broadcast %265 : f32 to vector<8x256xf32>
    %267 = arith.mulf %266, %264 : vector<8x256xf32>
    %268 = arith.addf %259, %267 : vector<8x256xf32>
    %269 = vector.extract_strided_slice %236 {offsets = [0, 17], sizes = [8, 256], strides = [1, 1]} : vector<8x290xf32> to vector<8x256xf32>
    %c31 = arith.constant 31 : index
    %270 = memref.load %arg1[%c31] : memref<36xf32, #tpu.memory_space<smem>>
    %271 = vector.broadcast %270 : f32 to vector<8x256xf32>
    %272 = arith.mulf %271, %269 : vector<8x256xf32>
    %273 = arith.addf %268, %272 : vector<8x256xf32>
    %274 = vector.extract_strided_slice %236 {offsets = [0, 18], sizes = [8, 256], strides = [1, 1]} : vector<8x290xf32> to vector<8x256xf32>
    %cst_37 = arith.constant 0.000000e+00 : f32
    %275 = vector.shape_cast %20 : vector<1x256xi1> to vector<1x256xi1>
    %276 = vector.broadcast %275 : vector<1x256xi1> to vector<8x256xi1>
    %277 = vector.broadcast %cst_37 : f32 to vector<8x256xf32>
    %278 = arith.select %276, %274, %277 : vector<8x256xi1>, vector<8x256xf32>
    %c32 = arith.constant 32 : index
    %279 = memref.load %arg1[%c32] : memref<36xf32, #tpu.memory_space<smem>>
    %280 = vector.broadcast %279 : f32 to vector<8x256xf32>
    %281 = arith.mulf %280, %278 : vector<8x256xf32>
    %282 = arith.addf %273, %281 : vector<8x256xf32>
    %283 = vector.extract_strided_slice %236 {offsets = [0, 32], sizes = [8, 256], strides = [1, 1]} : vector<8x290xf32> to vector<8x256xf32>
    %cst_38 = arith.constant 0.000000e+00 : f32
    %284 = vector.shape_cast %18 : vector<1x256xi1> to vector<1x256xi1>
    %285 = vector.broadcast %284 : vector<1x256xi1> to vector<8x256xi1>
    %286 = vector.broadcast %cst_38 : f32 to vector<8x256xf32>
    %287 = arith.select %285, %283, %286 : vector<8x256xi1>, vector<8x256xf32>
    %c33 = arith.constant 33 : index
    %288 = memref.load %arg1[%c33] : memref<36xf32, #tpu.memory_space<smem>>
    %289 = vector.broadcast %288 : f32 to vector<8x256xf32>
    %290 = arith.mulf %289, %287 : vector<8x256xf32>
    %291 = arith.addf %282, %290 : vector<8x256xf32>
    %292 = vector.extract_strided_slice %236 {offsets = [0, 33], sizes = [8, 256], strides = [1, 1]} : vector<8x290xf32> to vector<8x256xf32>
    %c34 = arith.constant 34 : index
    %293 = memref.load %arg1[%c34] : memref<36xf32, #tpu.memory_space<smem>>
    %294 = vector.broadcast %293 : f32 to vector<8x256xf32>
    %295 = arith.mulf %294, %292 : vector<8x256xf32>
    %296 = arith.addf %291, %295 : vector<8x256xf32>
    %297 = vector.extract_strided_slice %236 {offsets = [0, 34], sizes = [8, 256], strides = [1, 1]} : vector<8x290xf32> to vector<8x256xf32>
    %cst_39 = arith.constant 0.000000e+00 : f32
    %298 = vector.shape_cast %20 : vector<1x256xi1> to vector<1x256xi1>
    %299 = vector.broadcast %298 : vector<1x256xi1> to vector<8x256xi1>
    %300 = vector.broadcast %cst_39 : f32 to vector<8x256xf32>
    %301 = arith.select %299, %297, %300 : vector<8x256xi1>, vector<8x256xf32>
    %c35 = arith.constant 35 : index
    %302 = memref.load %arg1[%c35] : memref<36xf32, #tpu.memory_space<smem>>
    %303 = vector.broadcast %302 : f32 to vector<8x256xf32>
    %304 = arith.mulf %303, %301 : vector<8x256xf32>
    %305 = arith.addf %296, %304 : vector<8x256xf32>
    %cst_40 = arith.constant 0.000000e+00 : f32
    %306 = vector.broadcast %cst_40 : f32 to vector<8x256xf32>
    %307 = arith.subf %306, %305 : vector<8x256xf32>
    %308 = math.exp %307 : vector<8x256xf32>
    %cst_41 = arith.constant 1.000000e+00 : f32
    %309 = vector.broadcast %cst_41 : f32 to vector<8x256xf32>
    %310 = arith.addf %309, %308 : vector<8x256xf32>
    %cst_42 = arith.constant 1.000000e+00 : f32
    %311 = vector.broadcast %cst_42 : f32 to vector<8x256xf32>
    %312 = arith.divf %311, %310 : vector<8x256xf32>
    %c0_43 = arith.constant 0 : index
    %c0_44 = arith.constant 0 : index
    %c0_45 = arith.constant 0 : index
    %313 = vector.load %arg3[%c0_43, %c0_44, %c0_45] : memref<1x8x256xf32, #tpu.memory_space<vmem>>, vector<1x8x256xf32>
    %314 = vector.shape_cast %313 : vector<1x8x256xf32> to vector<8x256xf32>
    %315 = vector.shape_cast %312 : vector<8x256xf32> to vector<1x8x256xf32>
    tpu.vector_store %arg3[%c0_43, %c0_44, %c0_45], %315 {strides = array<i32>} : memref<1x8x256xf32, #tpu.memory_space<vmem>>, vector<1x8x256xf32>,
    return
  }
  func.func @transform_0(%arg0: i32) -> i32 {
    %c0_i32 = arith.constant 0 : i32
    %c0_i32_0 = arith.constant 0 : i32
    return %c0_i32 : i32
  }
  func.func @transform_1(%arg0: i32) -> (i32, i32, i32) {
    %c0_i32 = arith.constant 0 : i32
    %c0_i32_0 = arith.constant 0 : i32
    %c0_i32_1 = arith.constant 0 : i32
    return %c0_i32, %arg0, %c0_i32_0 : i32, i32, i32
  }
  func.func @transform_2(%arg0: i32) -> (i32, i32, i32) {
    %c0_i32 = arith.constant 0 : i32
    %c0_i32_0 = arith.constant 0 : i32
    %c0_i32_1 = arith.constant 0 : i32
    return %c0_i32, %arg0, %c0_i32_0 : i32, i32, i32
  }
}

</mosaic_0001>

<bundles_post_ra>
// kernel: tpu_custom_call.1
= control target key start
LH: loop header
LB: loop body
LE: loop exit
PB: predicated region body
PF: predicated region fallthrough
CT: control target
= control target key end

     0   :  { %7 = vsyncpa [#allocation5], 0  ;;  %s1900_s0 = inlined_call_operand.hbm [shape: f32[36], index: 0, kind: input, shape index: {}]   ;;  %s1901_s1 = inlined_call_operand.hbm [shape: f32[4,16,290], index: 1, kind: input, shape index: {}]   ;;  %s1902_s2 = inlined_call_operand.hbm [shape: f32[1,16,256], index: 2, kind: output, shape index: {}]  }
   0x1   :  { %8 = vsyncpa [#allocation3], 0 }
   0x2   :  { %10 = vsyncpa [#allocation3 + $0x1], 0 }
   0x3   :  { %11 = vsyncpa [#allocation4], 0 }
   0x4   :  { %13 = vsyncpa [#allocation4 + $0x1], 0  ;;  %s1266_s9 = smov 0   ;;  %s1268_s10 = smov 0  }
   0x5   :  { %s1270_s11 = smov 0   ;;  %s1272_s12 = smov 0  }
   0x6 LB: > { %s1287_s13 = sadd.s32 4294967295, %s1235_s12   ;;  %s991_s14 = sadd.s32 4294967294, %s1235_s12   ;;  %s1235_s12 = sphi %s1272_s12, %s1932_s12   ;;  %s1231_s11 = sphi %s1270_s11, %s1931_s11   ;;  %s1227_s10 = sphi %s1268_s10, %s1930_s10   ;;  %s1223_s9 = sphi %s1266_s9, %s1929_s9  }
   0x7   : > { %s1291_s15 = sadd.s32 1, %s1235_s12   ;;  %s47_s16 = sadd.s32 1, %s1231_s11 }
   0x8   : > { %s44_s17 = ssub.s32 %s1235_s12, %s1291_s15  ;;  %p54_p0 = scmp.ne.s32.totalorder %s1231_s11, %s1227_s10 }
   0x9   : > { %p45_p1 = scmp.eq.s32.totalorder %s44_s17, 0  ;;  %p55_p2 = scmp.eq.s32.totalorder %s1235_s12, 0 }
   0xa   : > { %p60_p3 = scmp.ne.s32.totalorder %s1227_s10, %s1223_s9  ;;  %p1903_p4 = scmp.eq.s32.totalorder %s1287_s13, 0 }
   0xb   : > { %s1303_s18 = scalar_select %p45_p1, %s1231_s11, %s47_s16  }
   0xc   : > { %p1305_p5 = por %p55_p2, %p54_p0  ;;  %p1311_p6 = por %p1903_p4, %p60_p3 }
   0xd   : > { %p84_p7 = scmp.eq.s32.totalorder %s1287_s13, 1  ;;  %p90_p8 = scmp.eq.s32.totalorder %s991_s14, 1 }
   0xe   : > { %s1908_s20 = scalar_select %p1311_p6, 1, 0 }
   0xf   : > { %p992_p9 = scmp.ge.s32.totalorder %s1235_s12, 1  ;;  %p97_p10 = scmp.lt.s32.totalorder %s1235_s12, 3 }
  0x10   : > { %p1318_p11 = por %p84_p7, %p54_p0  ;;  %p1322_p12 = por %p90_p8, %p60_p3 }
  0x11   : > { %p1326_p13 = pnand %p992_p9, %p97_p10  ;;  %p1073_p4 = scmp.lt.s32.totalorder %s1235_s12, 2 }
  0x12   : > { %s1909_s21 = scalar_select %p1318_p11, 1, 0 }
  0x13   : > { %s1910_s22 = scalar_select %p1322_p12, 1, 0 }
  0x14   : > { %s1911_s23 = scalar_select %p1326_p13, 1, 0 }
  0x15   : > { %p1060_p2 = pneg %p1326_p13  ;;  %s119_s24 = sand.u32 1, %s1231_s11  }
  0x16   : > { %s1050_s25 = smul.u32 384, %s1235_s12  ;;  %p1912_p6 = scmp.eq.s32.totalorder %s1287_s13, 0 }
  0x17   : > { %p1340_p7 = pnand %p1073_p4, %p1305_p5  ;;  %s1049_s27 = smul.u32 96, %s119_s24 }
  0x18   : > { %p1061_p0 = pnand %p1060_p2, %p1912_p6  ;;  %s1237_s28 = smov [#allocation2]  }
  0x19   : > { %s1350_s5 = scalar_lea.hbm %s1901_s1, %s1050_s25  ;;  %s123_s6 = scalar_lea.vmem [#allocation6], %s1049_s27 }
  0x1a   : > { %1063 = dma.hbm_to_smem (!%p1061_p0), %s1900_s0, 16, %s1237_s28, [#allocation5]  }
  0x1b   : > { %s130_s7 = sshll.u32 %s123_s6, 4  ;;  %s1354_s8 = scalar_lea.sflag [#allocation3], %s119_s24  ;;  %s1352_s7 = int_to_ptr.vmem [resolvable:$true] %s130_s7 }
  0x1c   : > { %s1139_s14 = scalar_lea.hbm %s1350_s5, 1536  ;;  %p1141_p4 = pneg %p1340_p7 }
  0x1d   : > { %p1140_p3 = scmp.ne.s32.totalorder %s1350_s5, %s1139_s14  ;;  %s1144_s19 = scalar_lea.hbm %s1901_s1, 3072 }
  0x1e   : > { %p1145_p8 = scmp.lt.s32.totalorder %s1350_s5, %s1901_s1  ;;  %p1146_p9 = scmp.lt.s32.totalorder %s1144_s19, %s1139_s14 }
  0x1f   : > { %p1142_p5 = pnand %p1141_p4, %p1140_p3 }
  0x20   : > { %p1147_p10 = por %p1146_p9, %p1145_p8 }
  0x21   : > { %p1143_p6 = pneg %p1142_p5 }
  0x23   : > { %p1148_p2 = pnand %p1147_p10, %p1143_p6 }
  0x25   : > { %1151 = shalt.err (!%p1148_p2)
}
  0x26   : > { %s1152_s24 = scalar_lea.vmem %s1352_s7, 1536  ;;  %s1238_s27 = smov [#allocation6]  }
  0x27   : > { %p1153_p0 = scmp.ne.s32.totalorder %s1352_s7, %s1152_s24  ;;  %s1157_s29 = sshll.u32 %s1238_s27, 4  ;;  %s1158_s29 = int_to_ptr.vmem [resolvable:$false] %s1157_s29 }
  0x28   : > { %s1159_s30 = scalar_lea.vmem %s1158_s29, 3072  ;;  %p1160_p5 = scmp.lt.s32.totalorder %s1352_s7, %s1158_s29 }
  0x29   : > { %p1155_p1 = pnand %p1153_p0, %p1141_p4  ;;  %p1161_p12 = scmp.lt.s32.totalorder %s1159_s30, %s1152_s24 }
  0x2b   : > { %p1156_p3 = pneg %p1155_p1  ;;  %p1162_p11 = por %p1161_p12, %p1160_p5 }
  0x2d   : > { %p1163_p13 = pnand %p1162_p11, %p1156_p3 }
  0x2f   : > { %1166 = shalt.err (!%p1163_p13)
}
  0x30   : > { %s1239_s3 = smov 768   ;;  %s1240_s4 = smov 384  }
  0x31   : > { %s1241_s6 = smov 24   ;;  %p1914_p1 = scmp.ne.s32.totalorder %s1911_s23, 0 }
  0x32   : > { %1067 = dma.hbm_to_vmem [thread:$0]  (!%p1340_p7), %s1350_s5, 1536, %s1352_s7, %s1354_s8, %s1239_s3, %s1240_s4, %s1241_s6  }
  0x33   : > { %142 = sbr.rel (%p1914_p1) target bundleno = 425 (0x1a9), region = 28  ;;  %p1915_p4 = scmp.eq.s32.totalorder (!%p1914_p1), %s1287_s13, 0 }
  0x38   : > { %1210 = dma.done.wait (%p1915_p4), [#allocation5], 16   ;;  %p1916_p6 = pmov %p1915_p4 }
  0x39   : > { %s1382_s14 = sand.u32 1, %s1227_s10   ;;  %p1917_p11 = scmp.ne.s32.totalorder %s1908_s20, 0 }
  0x3a   : > { %1212 = vsyncadd (%p1916_p6), [#allocation5], 4294967280  ;;  %s1051_s16 = smul.u32 96, %s1382_s14  ;;  %s149_s17 = scalar_lea.sflag [#allocation3], %s1382_s14 }
  0x3c   : > { %s1386_s19 = scalar_lea.vmem [#allocation6], %s1051_s16 }
  0x3d   : > { %1214 = dma.done.wait (%p1917_p11), %s149_s17, 1536  }
  0x3e   : > { %1216 = vsyncadd (%p1917_p11), %s149_s17, 4294965760 }
  0x3f   : > { %157 = sfence }
  0x40   : > { %v1393_v0 = vld [vmem:[%s1386_s19] sm:$0xff]  ;;  %v1396_v1 = vld [vmem:[%s1386_s19 + $0x8] sm:$0xff]  ;;  %s999_s23 = sld [smem:[#allocation2 + $0x1]]  ;;  %s1242_s26 = smov 126   ;;  %v207_v2 = vld [vmem:[%s1386_s19 + $0x10] sm:$0xff]  ;;  %v174_v37 = vlaneseq  ;;  %vm254_vm0 = vcmask 1031168  }
  0x41   : > { %248 = vrot.lane.b32.xlu1 %v1393_v0, %s1242_s26  ;;  %250 = vrot.lane.b32.xlu0 %v1396_v1, %s1242_s26  ;;  %s1002_s5 = sld [smem:[#allocation2 + $0x4]]  ;;  %s1243_s20 = smov 127   ;;  %v1439_v15 = vld [vmem:[%s1386_s19 + $0x20] sm:$0xff]  ;;  %v1442_v17 = vld [vmem:[%s1386_s19 + $0x18] sm:$0xff]  ;;  %vm234_vm5 = vcmask 1039360   ;;  %vm273_vm6 = vcmask 916480  }
  0x42   : > { %s1244_s7 = smov 112   ;;  %s1245_s8 = smov 111   ;;  %v1009_v19 = vld [vmem:[%s1386_s19 + $0x28] sm:$0xff]  ;;  %v1486_v30 = vld [vmem:[%s1386_s19 + $0x38] sm:$0xff]  ;;  %v1489_v32 = vld [vmem:[%s1386_s19 + $0x30] sm:$0xff]  ;;  %v175_v38 = vand.u32 127, %v174_v37 }
  0x43   : > { %s1005_s25 = sld [smem:[#allocation2 + $0x7]]  ;;  %s1246_s28 = smov 110   ;;  %v1496_v34 = vld [vmem:[%s1386_s19 + $0x40] sm:$0xff]  ;;  %vm300_vm7 = vcmask 908288   ;;  %vm313_vm8 = vcmask 900096   ;;  %vm332_vm9 = vcmask 785408  }
  0x44   : > { %s1247_s24 = smov 96   ;;  %s1248_s27 = smov 95   ;;  %v176_v39 = vadd.s32 128, %v175_v38  ;;  %v181_v44 = vand.u32 15, %v175_v38  ;;  %vm359_vm10 = vcmask 777216   ;;  %vm372_vm11 = vcmask 769024  }
  0x45   : > { %252 = vrot.lane.b32.xlu1 %v207_v2, %s1242_s26  ;;  %s1011_s29 = sld [smem:[#allocation2 + $0xa]]  ;;  %s1249_s30 = smov 94  }
  0x46   : > { %v221_v3 = vstv %s999_s23  ;;  %s1014_s3 = sld [smem:[#allocation2 + $0xd]]  ;;  %v188_v45 = vand.u32 15, %v176_v39  ;;  %vm1523_vm1 = vcmp.ge.s32.totalorder %v181_v44, 1  ;;  %vm1536_vm3 = vcmp.lt.s32.totalorder %v181_v44, 15  ;;  %v1592_v39 = vld [vmem:[%s1386_s19 + $0x50] sm:$0xff]  ;;  %p1926_p13 = scmp.ne.s32.totalorder %s1909_s21, 0 }
  0x47   : > { %v224_v4 = vmul.f32 %v221_v3, %v207_v2  ;;  %v222_v5 = vmul.f32 %v221_v3, %v1393_v0  ;;  %v223_v6 = vmul.f32 %v221_v3, %v1396_v1  ;;  %v287_v7 = vstv %s1002_s5  ;;  %s1017_s4 = sld [smem:[#allocation2 + $0x10]] }
  0x48   : > { %v288_v8 = vmul.f32 %v287_v7, %v1393_v0  ;;  %v290_v9 = vmul.f32 %v287_v7, %v207_v2  ;;  %v289_v10 = vmul.f32 %v287_v7, %v1396_v1  ;;  %s1023_s6 = sld [smem:[#allocation2 + $0x13]]  ;;  %vm1527_vm2 = vcmp.ge.s32.totalorder %v188_v45, 1 }
  0x49   : > { %232 = vrot.lane.b32.xlu1 %v224_v4, %s1243_s20  ;;  %228 = vrot.lane.b32.xlu0 %v222_v5, %s1243_s20  ;;  %v346_v11 = vstv %s1005_s25  ;;  %s1026_s16 = sld [smem:[#allocation2 + $0x16]]  ;;  %v212_v54 = vsel %vm1523_vm1, %v1393_v0, 0.0  ;;  %v213_v55 = vsel %vm1527_vm2, %v1396_v1, 0.0  ;;  %vm1547_vm4 = vcmp.lt.s32.totalorder %v188_v45, 15  ;;  %v1599_v45 = vld [vmem:[%s1386_s19 + $0x48] sm:$0xff] }
  0x4a   : > { %v348_v12 = vmul.f32 %v346_v11, %v1396_v1  ;;  %v347_v13 = vmul.f32 %v346_v11, %v1393_v0  ;;  %v349_v14 = vmul.f32 %v346_v11, %v207_v2  ;;  %s1513_s17 = sld [smem:[#allocation2]] }
  0x4b   : > { %v398_v16 = vstv %s1011_s29  ;;  %s1515_s23 = sld [smem:[#allocation2 + $0x2]] }
  0x4c   : > { %v399_v18 = vmul.f32 %v1442_v17, %v398_v16  ;;  %v401_v20 = vmul.f32 %v1009_v19, %v398_v16  ;;  %v400_v21 = vmul.f32 %v1439_v15, %v398_v16  ;;  %v457_v22 = vstv %s1014_s3  ;;  %s1029_s5 = sld [smem:[#allocation2 + $0x19]] }
  0x4d   : > { %269 = vrot.lane.b32.xlu1 %v1396_v1, %s1244_s7  ;;  %230 = vrot.lane.b32.xlu0 %v223_v6, %s1243_s20  ;;  %v459_v23 = vmul.f32 %v1439_v15, %v457_v22  ;;  %v458_v24 = vmul.f32 %v1442_v17, %v457_v22  ;;  %v460_v25 = vmul.f32 %v1009_v19, %v457_v22  ;;  %v513_v26 = vstv %s1017_s4  ;;  %s1551_s25 = sld [smem:[#allocation2 + $0x3]] }
  0x4e   : > { %v514_v27 = vmul.f32 %v1442_v17, %v513_v26  ;;  %v516_v28 = vmul.f32 %v1009_v19, %v513_v26  ;;  %v515_v29 = vmul.f32 %v1439_v15, %v513_v26  ;;  %v563_v31 = vstv %s1023_s6  ;;  %s1035_s29 = sld [smem:[#allocation2 + $0x1c]] }
  0x4f   : > { %v564_v33 = vmul.f32 %v1489_v32, %v563_v31  ;;  %v566_v35 = vmul.f32 %v1496_v34, %v563_v31  ;;  %v565_v36 = vmul.f32 %v1486_v30, %v563_v31  ;;  %v622_v40 = vstv %s1026_s16  ;;  %s1576_s3 = sld [smem:[#allocation2 + $0x5]] }
  0x50   : > { %v624_v46 = vmul.f32 %v1486_v30, %v622_v40  ;;  %v623_v51 = vmul.f32 %v1489_v32, %v622_v40  ;;  %v215_v53 = vstv %s1513_s17  ;;  %v625_v63 = vmul.f32 %v1496_v34, %v622_v40  ;;  %s1595_s4 = sld [smem:[#allocation2 + $0x6]] }
  0x51   : > { %294 = vrot.lane.b32.xlu1 %v288_v8, %s1245_s8  ;;  %267 = vrot.lane.b32.xlu0 %v1393_v0, %s1244_s7  ;;  %v262_v59 = vstv %s1515_s23  ;;  %v216_v61 = vmul.f32 %v215_v53, %v212_v54  ;;  %v217_v62 = vmul.f32 %v215_v53, %v213_v55  ;;  %v1609_v55 = vld [vmem:[%s1386_s19 + $0x58] sm:$0xff]  ;;  %s1618_s6 = sld [smem:[#allocation2 + $0x8]] }
  0x52   : > { %s1038_s19 = sld [smem:[#allocation2 + $0x1f]] }
  0x53   : > { %s1667_s16 = sld [smem:[#allocation2 + $0xc]] }
  0x54   : > { %v728_v40 = vstv %s1035_s29  ;;  %s1025_s17 = sld [smem:[#allocation2 + $0x15]] }
  0x55   : > { %298 = vrot.lane.b32.xlu1 %v290_v9, %s1245_s8  ;;  %271 = vrot.lane.b32.xlu0 %v207_v2, %s1244_s7  ;;  %v678_v9 = vstv %s1029_s5  ;;  %s1750_s23 = sld [smem:[#allocation2 + $0x17]] }
  0x56   : > { %v681_v26 = vmul.f32 %v1496_v34, %v678_v9  ;;  %v680_v37 = vmul.f32 %v1486_v30, %v678_v9  ;;  %s1757_s5 = sld [smem:[#allocation2 + $0x18]] }
  0x57   : > { %s1783_s29 = sld [smem:[#allocation2 + $0x1b]] }
  0x59   : > { %309 = vrot.lane.b32.xlu1 %v1396_v1, %s1246_s28  ;;  %296 = vrot.lane.b32.xlu0 %v289_v10, %s1245_s8 }
  0x5d   : > { %326 = vrot.lane.b32.xlu1 %v1393_v0, %s1247_s24  ;;  %307 = vrot.lane.b32.xlu0 %v1393_v0, %s1246_s28 }
  0x61   : > { %330 = vrot.lane.b32.xlu1 %v207_v2, %s1247_s24  ;;  %311 = vrot.lane.b32.xlu0 %v207_v2, %s1246_s28 }
  0x65   : > { %355 = vrot.lane.b32.xlu1 %v348_v12, %s1248_s27  ;;  %328 = vrot.lane.b32.xlu0 %v1396_v1, %s1247_s24 }
  0x69   : > { %368 = vrot.lane.b32.xlu1 %v1396_v1, %s1249_s30  ;;  %353 = vrot.lane.b32.xlu0 %v347_v13, %s1248_s27  ;;  %v281_v13 = vstv %s1551_s25  ;;  %s1781_s25 = sld [smem:[#allocation2 + $0x1a]] }
  0x6d   : > { %357 = vrot.lane.b32.xlu1 %v349_v14, %s1248_s27  ;;  %366 = vrot.lane.b32.xlu0 %v1393_v0, %s1249_s30 }
  0x71   : > { %370 = vrot.lane.b32.xlu0 %v207_v2, %s1249_s30  ;;  %422 = vrot.lane.b32.xlu1 %v1439_v15, %s1242_s26 }
  0x75   : > { %420 = vrot.lane.b32.xlu0 %v1442_v17, %s1242_s26  ;;  %405 = vrot.lane.b32.xlu1 %v399_v18, %s1243_s20 }
  0x79   : > { %424 = vrot.lane.b32.xlu0 %v1009_v19, %s1242_s26  ;;  %409 = vrot.lane.b32.xlu1 %v401_v20, %s1243_s20 }
  0x7d   : > { %407 = vrot.lane.b32.xlu0 %v400_v21, %s1243_s20  ;;  %440 = vrot.lane.b32.xlu1 %v1439_v15, %s1244_s7 }
  0x81   : > { %438 = vrot.lane.b32.xlu0 %v1442_v17, %s1244_s7  ;;  %476 = vrot.lane.b32.xlu1 %v1442_v17, %s1246_s28 }
  0x85   : > { %442 = vrot.lane.b32.xlu0 %v1009_v19, %s1244_s7  ;;  %480 = vrot.lane.b32.xlu1 %v1009_v19, %s1246_s28 }
  0x89   : > { %478 = vrot.lane.b32.xlu0 %v1439_v15, %s1246_s28  ;;  %466 = vrot.lane.b32.xlu1 %v459_v23, %s1245_s8 }
  0x8d   : > { %464 = vrot.lane.b32.xlu0 %v458_v24, %s1245_s8  ;;  %494 = vrot.lane.b32.xlu1 %v1442_v17, %s1247_s24 }
  0x91   : > { %468 = vrot.lane.b32.xlu0 %v460_v25, %s1245_s8  ;;  %498 = vrot.lane.b32.xlu1 %v1009_v19, %s1247_s24 }
  0x95   : > { %496 = vrot.lane.b32.xlu0 %v1439_v15, %s1247_s24  ;;  %534 = vrot.lane.b32.xlu1 %v1439_v15, %s1249_s30 }
  0x99   : > { %532 = vrot.lane.b32.xlu0 %v1442_v17, %s1249_s30  ;;  %520 = vrot.lane.b32.xlu1 %v514_v27, %s1248_s27 }
  0x9d   : > { %536 = vrot.lane.b32.xlu0 %v1009_v19, %s1249_s30  ;;  %524 = vrot.lane.b32.xlu1 %v516_v28, %s1248_s27  ;;  %v679_v19 = vmul.f32 %v1489_v32, %v678_v9 }
  0xa1   : > { %522 = vrot.lane.b32.xlu0 %v515_v29, %s1248_s27  ;;  %587 = vrot.lane.b32.xlu1 %v1486_v30, %s1242_s26 }
  0xa5   : > { %585 = vrot.lane.b32.xlu0 %v1489_v32, %s1242_s26  ;;  %570 = vrot.lane.b32.xlu1 %v564_v33, %s1243_s20 }
  0xa9   : > { %589 = vrot.lane.b32.xlu0 %v1496_v34, %s1242_s26  ;;  %574 = vrot.lane.b32.xlu1 %v566_v35, %s1243_s20 }
  0xad   : > { %572 = vrot.lane.b32.xlu0 %v565_v36, %s1243_s20  ;;  %605 = vrot.lane.b32.xlu1 %v1486_v30, %s1244_s7 }
  0xb1   : > { %603 = vrot.lane.b32.xlu0 %v1489_v32, %s1244_s7  ;;  %641 = vrot.lane.b32.xlu1 %v1489_v32, %s1246_s28 }
  0xb3   : > { %v249_v41 = vpop.permute.xlu1 %248  ;;  %v251_v42 = vpop.permute.xlu0 %250 }
  0xb4   : > { %v255_v43 = vsel %vm254_vm0, %v249_v41, %v251_v42 }
  0xb5   : > { %607 = vrot.lane.b32.xlu0 %v1496_v34, %s1244_s7  ;;  %645 = vrot.lane.b32.xlu1 %v1496_v34, %s1246_s28  ;;  %v259_v60 = vsel %vm1536_vm3, %v255_v43, 0.0 }
  0xb6   : > { %v263_v3 = vmul.f32 %v262_v59, %v259_v60 }
  0xb7   : > { %v253_v47 = vpop.permute.xlu1 %252 }
  0xb8   : > { %v256_v50 = vsel %vm254_vm0, %v251_v42, %v253_v47  ;;  %v321_v42 = vstv %s1576_s3  ;;  %s1798_s3 = sld [smem:[#allocation2 + $0x1d]] }
  0xb9   : > { %643 = vrot.lane.b32.xlu0 %v1486_v30, %s1246_s28  ;;  %631 = vrot.lane.b32.xlu1 %v624_v46, %s1245_s8  ;;  %v260_v0 = vsel %vm1547_vm4, %v256_v50, 0.0  ;;  %v729_v46 = vmul.f32 %v1599_v45, %v728_v40 }
  0xba   : > { %v264_v6 = vmul.f32 %v262_v59, %v260_v0 }
  0xbb   : > { %v233_v57 = vpop.permute.xlu1 %232  ;;  %v229_v58 = vpop.permute.xlu0 %228 }
  0xbd   : > { %629 = vrot.lane.b32.xlu0 %v623_v51, %s1245_s8  ;;  %659 = vrot.lane.b32.xlu1 %v1489_v32, %s1247_s24 }
  0xbf   : > { %v270_v1 = vpop.permute.xlu1 %269  ;;  %v231_v2 = vpop.permute.xlu0 %230 }
  0xc0   : > { %v235_v4 = vsel %vm234_vm5, %v229_v58, %v231_v2  ;;  %v236_v5 = vsel %vm234_vm5, %v231_v2, %v233_v57  ;;  %v731_v58 = vmul.f32 %v1609_v55, %v728_v40 }
  0xc1   : > { %v239_v7 = vadd.f32 %v235_v4, %v216_v61  ;;  %v240_v8 = vadd.f32 %v236_v5, %v217_v62  ;;  %633 = vrot.lane.b32.xlu0 %v625_v63, %s1245_s8  ;;  %663 = vrot.lane.b32.xlu1 %v1496_v34, %s1247_s24  ;;  %v340_v61 = vstv %s1595_s4  ;;  %v730_v4 = vmul.f32 %v1592_v39, %v728_v40  ;;  %s1800_s4 = sld [smem:[#allocation2 + $0x1e]] }
  0xc2   : > { %v389_v40 = vsel %vm1523_vm1, %v1442_v17, 0.0 }
  0xc3   : > { %v265_v10 = vadd.f32 %v263_v3, %v239_v7  ;;  %v266_v11 = vadd.f32 %v264_v6, %v240_v8  ;;  %v295_v12 = vpop.permute.xlu1 %294  ;;  %v268_v14 = vpop.permute.xlu0 %267 }
  0xc4   : > { %v274_v16 = vsel %vm273_vm6, %v268_v14, %v270_v1  ;;  %v380_v14 = vstv %s1618_s6  ;;  %s1039_s6 = sld [smem:[#allocation2 + $0x20]] }
  0xc5   : > { %v278_v18 = vsel %vm1523_vm1, %v274_v16, 0.0  ;;  %661 = vrot.lane.b32.xlu0 %v1486_v30, %s1247_s24  ;;  %699 = vrot.lane.b32.xlu1 %v1486_v30, %s1249_s30 }
  0xc6   : > { %v282_v20 = vmul.f32 %v281_v13, %v278_v18 }
  0xc7   : > { %v299_v21 = vpop.permute.xlu1 %298  ;;  %v272_v22 = vpop.permute.xlu0 %271 }
  0xc8   : > { %v275_v23 = vsel %vm273_vm6, %v270_v1, %v272_v22  ;;  %v284_v24 = vadd.f32 %v282_v20, %v265_v10 }
  0xc9   : > { %v279_v25 = vsel %vm1527_vm2, %v275_v23, 0.0  ;;  %697 = vrot.lane.b32.xlu0 %v1489_v32, %s1249_s30  ;;  %685 = vrot.lane.b32.xlu1 %v679_v19, %s1248_s27  ;;  %v787_v23 = vstv %s1038_s19  ;;  %s1827_s19 = sld [smem:[#allocation2 + $0x21]] }
  0xca   : > { %v283_v27 = vmul.f32 %v281_v13, %v279_v25 }
  0xcb   : > { %v310_v28 = vpop.permute.xlu1 %309  ;;  %v297_v29 = vpop.permute.xlu0 %296 }
  0xcc   : > { %v285_v31 = vadd.f32 %v283_v27, %v266_v11  ;;  %v301_v33 = vsel %vm300_vm7, %v295_v12, %v297_v29  ;;  %v302_v35 = vsel %vm300_vm7, %v297_v29, %v299_v21  ;;  %v789_v29 = vmul.f32 %v1592_v39, %v787_v23 }
  0xcd   : > { %v305_v36 = vadd.f32 %v301_v33, %v284_v24  ;;  %701 = vrot.lane.b32.xlu0 %v1496_v34, %s1249_s30  ;;  %689 = vrot.lane.b32.xlu1 %v681_v26, %s1248_s27 }
  0xce   : > { %v306_v38 = vadd.f32 %v302_v35, %v285_v31 }
  0xcf   : > { %v327_v41 = vpop.permute.xlu1 %326  ;;  %v308_v43 = vpop.permute.xlu0 %307 }
  0xd0   : > { %v314_v44 = vsel %vm313_vm8, %v308_v43, %v310_v28 }
  0xd1   : > { %v318_v34 = vsel %vm1536_vm3, %v314_v44, 0.0  ;;  %687 = vrot.lane.b32.xlu0 %v680_v37, %s1248_s27  ;;  %752 = vrot.lane.b32.xlu1 %v1592_v39, %s1242_s26 }
  0xd2   : > { %v322_v47 = vmul.f32 %v321_v42, %v318_v34 }
  0xd3   : > { %v331_v50 = vpop.permute.xlu1 %330  ;;  %v312_v51 = vpop.permute.xlu0 %311 }
  0xd4   : > { %v324_v53 = vadd.f32 %v322_v47, %v305_v36  ;;  %v315_v54 = vsel %vm313_vm8, %v310_v28, %v312_v51 }
  0xd5   : > { %v319_v57 = vsel %vm1547_vm4, %v315_v54, 0.0  ;;  %750 = vrot.lane.b32.xlu0 %v1599_v45, %s1242_s26  ;;  %735 = vrot.lane.b32.xlu1 %v729_v46, %s1243_s20 }
  0xd6   : > { %v323_v59 = vmul.f32 %v321_v42, %v319_v57  ;;  %v788_v42 = vmul.f32 %v1599_v45, %v787_v23 }
  0xd7   : > { %v356_v60 = vpop.permute.xlu1 %355  ;;  %v329_v62 = vpop.permute.xlu0 %328 }
  0xd8   : > { %v325_v63 = vadd.f32 %v323_v59, %v306_v38  ;;  %v333_v0 = vsel %vm332_vm9, %v327_v41, %v329_v62  ;;  %v334_v1 = vsel %vm332_vm9, %v329_v62, %v331_v50  ;;  %v390_v41 = vsel %vm1527_vm2, %v1439_v15, 0.0 }
  0xd9   : > { %v337_v2 = vsel %vm1523_vm1, %v333_v0, 0.0  ;;  %v338_v3 = vsel %vm1527_vm2, %v334_v1, 0.0  ;;  %754 = vrot.lane.b32.xlu0 %v1609_v55, %s1242_s26  ;;  %739 = vrot.lane.b32.xlu1 %v731_v58, %s1243_s20  ;;  %s1635_s26 = sld [smem:[#allocation2 + $0x9]]  ;;  %v790_v50 = vmul.f32 %v1609_v55, %v787_v23 }
  0xda   : > { %v341_v5 = vmul.f32 %v340_v61, %v337_v2  ;;  %v342_v6 = vmul.f32 %v340_v61, %v338_v3 }
  0xdb   : > { %v369_v7 = vpop.permute.xlu1 %368  ;;  %v354_v8 = vpop.permute.xlu0 %353 }
  0xdc   : > { %v343_v9 = vadd.f32 %v341_v5, %v324_v53  ;;  %v360_v10 = vsel %vm359_vm10, %v354_v8, %v356_v60  ;;  %v344_v11 = vadd.f32 %v342_v6, %v325_v63 }
  0xdd   : > { %737 = vrot.lane.b32.xlu0 %v730_v4, %s1243_s20  ;;  %770 = vrot.lane.b32.xlu1 %v1592_v39, %s1244_s7  ;;  %s1650_s20 = sld [smem:[#allocation2 + $0xb]]  ;;  %v451_v4 = vstv %s1667_s16 }
  0xde   : > { %v364_v12 = vadd.f32 %v360_v10, %v343_v9 }
  0xdf   : > { %v358_v13 = vpop.permute.xlu1 %357  ;;  %v367_v16 = vpop.permute.xlu0 %366  ;;  %v392_v36 = vstv %s1635_s26  ;;  %s1042_s26 = sld [smem:[#allocation2 + $0x23]] }
  0xe0   : > { %v361_v18 = vsel %vm359_vm10, %v356_v60, %v358_v13  ;;  %v373_v19 = vsel %vm372_vm11, %v367_v16, %v369_v7  ;;  %v393_v34 = vmul.f32 %v392_v36, %v389_v40  ;;  %v394_v46 = vmul.f32 %v392_v36, %v390_v41 }
  0xe1   : > { %v365_v20 = vadd.f32 %v361_v18, %v344_v11  ;;  %v377_v21 = vsel %vm1536_vm3, %v373_v19, 0.0  ;;  %768 = vrot.lane.b32.xlu0 %v1599_v45, %s1244_s7  ;;  %806 = vrot.lane.b32.xlu1 %v1599_v45, %s1246_s28 }
  0xe2   : > { %v381_v22 = vmul.f32 %v380_v14, %v377_v21 }
  0xe3   : > { %v371_v24 = vpop.permute.xlu0 %370  ;;  %v423_v25 = vpop.permute.xlu1 %422  ;;  %v433_v47 = vstv %s1650_s20  ;;  %s998_s20 = sshll.u32 %s1382_s14, 4 }
  0xe4   : > { %v383_v26 = vadd.f32 %v381_v22, %v364_v12  ;;  %v374_v27 = vsel %vm372_vm11, %v369_v7, %v371_v24  ;;  %s173_s16 = scalar_lea.vmem [#allocation7], %s998_s20 }
  0xe5   : > { %v378_v28 = vsel %vm1547_vm4, %v374_v27, 0.0  ;;  %772 = vrot.lane.b32.xlu0 %v1609_v55, %s1244_s7  ;;  %810 = vrot.lane.b32.xlu1 %v1609_v55, %s1246_s28  ;;  %s1041_s7 = sld [smem:[#allocation2 + $0x22]]  ;;  %v875_v48 = vstv %s1042_s26 }
  0xe6   : > { %v382_v31 = vmul.f32 %v380_v14, %v378_v28  ;;  %v395_v54 = vadd.f32 %v393_v34, %v383_v26 }
  0xe7   : > { %v421_v33 = vpop.permute.xlu0 %420  ;;  %v406_v35 = vpop.permute.xlu1 %405 }
  0xe8   : > { %v384_v37 = vadd.f32 %v382_v31, %v365_v20  ;;  %v426_v38 = vsel %vm254_vm0, %v421_v33, %v423_v25 }
  0xe9   : > { %808 = vrot.lane.b32.xlu0 %v1592_v39, %s1246_s28  ;;  %796 = vrot.lane.b32.xlu1 %v789_v29, %s1245_s8  ;;  %v430_v15 = vsel %vm1536_vm3, %v426_v38, 0.0  ;;  %s1016_s28 = sld [smem:[#allocation2 + $0xf]] }
  0xea   : > { %v396_v57 = vadd.f32 %v394_v46, %v384_v37  ;;  %v434_v59 = vmul.f32 %v433_v47, %v430_v15 }
  0xeb   : > { %v425_v43 = vpop.permute.xlu0 %424  ;;  %v410_v44 = vpop.permute.xlu1 %409  ;;  %v843_v1 = vstv %s1041_s7  ;;  %s1048_s7 = sshll.u32 %s1287_s13, 8  ;;  %s1250_s13 = smov [#allocation7]  }
  0xec   : > { %v427_v17 = vsel %vm254_vm0, %v423_v25, %v425_v43  ;;  %v844_v9 = vmul.f32 %v1599_v45, %v843_v1  ;;  %v846_v18 = vmul.f32 %v1609_v55, %v843_v1  ;;  %v845_v25 = vmul.f32 %v1592_v39, %v843_v1 }
  0xed   : > { %794 = vrot.lane.b32.xlu0 %v788_v42, %s1245_s8  ;;  %824 = vrot.lane.b32.xlu1 %v1599_v45, %s1247_s24  ;;  %v431_v51 = vsel %vm1547_vm4, %v427_v17, 0.0 }
  0xee   : > { %v435_v62 = vmul.f32 %v433_v47, %v431_v51 }
  0xef   : > { %v408_v53 = vpop.permute.xlu0 %407  ;;  %v441_v58 = vpop.permute.xlu1 %440 }
  0xf0   : > { %v411_v60 = vsel %vm234_vm5, %v406_v35, %v408_v53  ;;  %v412_v61 = vsel %vm234_vm5, %v408_v53, %v410_v44  ;;  %v507_v44 = vstv %s1016_s28 }
  0xf1   : > { %v415_v63 = vadd.f32 %v411_v60, %v395_v54  ;;  %v416_v0 = vadd.f32 %v412_v61, %v396_v57  ;;  %798 = vrot.lane.b32.xlu0 %v790_v50, %s1245_s8  ;;  %828 = vrot.lane.b32.xlu1 %v1609_v55, %s1247_s24  ;;  %s1693_s8 = sld [smem:[#allocation2 + $0xe]] }
  0xf3   : > { %v436_v2 = vadd.f32 %v434_v59, %v415_v63  ;;  %v437_v3 = vadd.f32 %v435_v62, %v416_v0  ;;  %v439_v5 = vpop.permute.xlu0 %438  ;;  %v477_v6 = vpop.permute.xlu1 %476 }
  0xf4   : > { %v444_v7 = vsel %vm273_vm6, %v439_v5, %v441_v58 }
  0xf5   : > { %v448_v8 = vsel %vm1523_vm1, %v444_v7, 0.0  ;;  %826 = vrot.lane.b32.xlu0 %v1592_v39, %s1247_s24  ;;  %864 = vrot.lane.b32.xlu1 %v1592_v39, %s1249_s30  ;;  %s1018_s24 = sld [smem:[#allocation2 + $0x11]] }
  0xf6   : > { %v452_v10 = vmul.f32 %v451_v4, %v448_v8 }
  0xf7   : > { %v443_v11 = vpop.permute.xlu0 %442  ;;  %v481_v12 = vpop.permute.xlu1 %480  ;;  %v489_v26 = vstv %s1693_s8  ;;  %s909_s8 = sshll.u32 %s173_s16, 4  ;;  %s1859_s8 = int_to_ptr.vmem [resolvable:$true] %s909_s8 }
  0xf8   : > { %v445_v13 = vsel %vm273_vm6, %v441_v58, %v443_v11  ;;  %v454_v14 = vadd.f32 %v452_v10, %v436_v2 }
  0xf9   : > { %v449_v16 = vsel %vm1527_vm2, %v445_v13, 0.0  ;;  %862 = vrot.lane.b32.xlu0 %v1599_v45, %s1249_s30  ;;  %850 = vrot.lane.b32.xlu1 %v844_v9, %s1248_s27 }
  0xfa   : > { %v453_v19 = vmul.f32 %v451_v4, %v449_v16 }
  0xfb   : > { %v479_v20 = vpop.permute.xlu0 %478  ;;  %v467_v21 = vpop.permute.xlu1 %466  ;;  %v545_v0 = vstv %s1018_s24 }
  0xfc   : > { %v482_v22 = vsel %vm313_vm8, %v477_v6, %v479_v20  ;;  %v483_v23 = vsel %vm313_vm8, %v479_v20, %v481_v12  ;;  %v455_v24 = vadd.f32 %v453_v19, %v437_v3 }
  0xfd   : > { %866 = vrot.lane.b32.xlu0 %v1609_v55, %s1249_s30  ;;  %854 = vrot.lane.b32.xlu1 %v846_v18, %s1248_s27  ;;  %v486_v27 = vsel %vm1536_vm3, %v482_v22, 0.0  ;;  %v487_v55 = vsel %vm1547_vm4, %v483_v23, 0.0  ;;  %s1732_s30 = sld [smem:[#allocation2 + $0x14]] }
  0xfe   : > { %v490_v33 = vmul.f32 %v489_v26, %v486_v27  ;;  %v491_v41 = vmul.f32 %v489_v26, %v487_v55 }
  0xff   : > { %v465_v28 = vpop.permute.xlu0 %464  ;;  %v495_v29 = vpop.permute.xlu1 %494 }
 0x100   : > { %v470_v31 = vsel %vm300_vm7, %v465_v28, %v467_v21 }
 0x101   : > { %v474_v35 = vadd.f32 %v470_v31, %v454_v14  ;;  %852 = vrot.lane.b32.xlu0 %v845_v25, %s1248_s27  ;;  %s1022_s27 = sld [smem:[#allocation2 + $0x12]] }
 0x103   : > { %v492_v36 = vadd.f32 %v490_v33, %v474_v35  ;;  %v469_v37 = vpop.permute.xlu0 %468  ;;  %v499_v38 = vpop.permute.xlu1 %498 }
 0x104   : > { %v471_v40 = vsel %vm300_vm7, %v467_v21, %v469_v37  ;;  %v555_v37 = vsel %vm1527_vm2, %v1486_v30, 0.0 }
 0x105   : > { %v475_v42 = vadd.f32 %v471_v40, %v455_v24 }
 0x107   : > { %v493_v43 = vadd.f32 %v491_v41, %v475_v42  ;;  %v497_v34 = vpop.permute.xlu0 %496  ;;  %v535_v46 = vpop.permute.xlu1 %534  ;;  %v557_v55 = vstv %s1022_s27  ;;  %s1857_s27 = scalar_lea.hbm %s1902_s2, %s1048_s7 }
 0x108   : > { %v500_v17 = vsel %vm332_vm9, %v495_v29, %v497_v34  ;;  %v501_v47 = vsel %vm332_vm9, %v497_v34, %v499_v38  ;;  %v559_v42 = vmul.f32 %v557_v55, %v555_v37 }
 0x109   : > { %v504_v15 = vsel %vm1523_vm1, %v500_v17, 0.0  ;;  %v505_v50 = vsel %vm1527_vm2, %v501_v47, 0.0 }
 0x10a   : > { %v508_v51 = vmul.f32 %v507_v44, %v504_v15  ;;  %v509_v53 = vmul.f32 %v507_v44, %v505_v50 }
 0x10b   : > { %v533_v54 = vpop.permute.xlu0 %532  ;;  %v521_v57 = vpop.permute.xlu1 %520 }
 0x10c   : > { %v538_v58 = vsel %vm372_vm11, %v533_v54, %v535_v46  ;;  %v510_v59 = vadd.f32 %v508_v51, %v492_v36  ;;  %v511_v60 = vadd.f32 %v509_v53, %v493_v43  ;;  %v554_v36 = vsel %vm1523_vm1, %v1489_v32, 0.0 }
 0x10d   : > { %v542_v1 = vsel %vm1536_vm3, %v538_v58, 0.0  ;;  %v558_v41 = vmul.f32 %v557_v55, %v554_v36  ;;  %v598_v51 = vstv %s1732_s30  ;;  %s895_s30 = scalar_lea.sflag [#allocation4], %s1382_s14 }
 0x10e   : > { %v546_v7 = vmul.f32 %v545_v0, %v542_v1 }
 0x10f   : > { %v537_v61 = vpop.permute.xlu0 %536  ;;  %v525_v62 = vpop.permute.xlu1 %524 }
 0x110   : > { %v539_v63 = vsel %vm372_vm11, %v535_v46, %v537_v61 }
 0x111   : > { %v543_v2 = vsel %vm1547_vm4, %v539_v63, 0.0 }
 0x112   : > { %v547_v8 = vmul.f32 %v545_v0, %v543_v2 }
 0x113   : > { %v523_v3 = vpop.permute.xlu0 %522  ;;  %v588_v4 = vpop.permute.xlu1 %587 }
 0x114   : > { %v526_v5 = vsel %vm359_vm10, %v521_v57, %v523_v3  ;;  %v527_v6 = vsel %vm359_vm10, %v523_v3, %v525_v62  ;;  %v616_v57 = vstv %s1025_s17  ;;  %s1167_s17 = scalar_lea.vmem %s1859_s8, 256 }
 0x115   : > { %v530_v9 = vadd.f32 %v526_v5, %v510_v59  ;;  %v531_v10 = vadd.f32 %v527_v6, %v511_v60  ;;  %p1168_p12 = scmp.ne.s32.totalorder %s1859_s8, %s1167_s17 }
 0x117   : > { %v548_v11 = vadd.f32 %v546_v7, %v530_v9  ;;  %v549_v12 = vadd.f32 %v547_v8, %v531_v10  ;;  %v586_v13 = vpop.permute.xlu0 %585  ;;  %v571_v14 = vpop.permute.xlu1 %570  ;;  %p1169_p7 = pnand %p1168_p12, %p1926_p13 }
 0x118   : > { %v591_v43 = vsel %vm254_vm0, %v586_v13, %v588_v4 }
 0x119   : > { %v560_v15 = vadd.f32 %v558_v41, %v548_v11  ;;  %v561_v50 = vadd.f32 %v559_v42, %v549_v12  ;;  %v595_v53 = vsel %vm1536_vm3, %v591_v43, 0.0  ;;  %p1170_p8 = pneg %p1169_p7 }
 0x11a   : > { %v599_v0 = vmul.f32 %v598_v51, %v595_v53 }
 0x11b   : > { %v590_v16 = vpop.permute.xlu0 %589  ;;  %v575_v18 = vpop.permute.xlu1 %574 }
 0x11c   : > { %v592_v44 = vsel %vm254_vm0, %v588_v4, %v590_v16 }
 0x11d   : > { %v596_v54 = vsel %vm1547_vm4, %v592_v44, 0.0 }
 0x11e   : > { %v600_v1 = vmul.f32 %v598_v51, %v596_v54 }
 0x11f   : > { %v573_v19 = vpop.permute.xlu0 %572  ;;  %v606_v20 = vpop.permute.xlu1 %605 }
 0x120   : > { %v576_v32 = vsel %vm234_vm5, %v571_v14, %v573_v19  ;;  %v577_v17 = vsel %vm234_vm5, %v573_v19, %v575_v18  ;;  %v654_v14 = vstv %s1750_s23  ;;  %v672_v19 = vstv %s1757_s5  ;;  %s1171_s23 = sshll.u32 %s1250_s13, 4  ;;  %s1172_s23 = int_to_ptr.vmem [resolvable:$false] %s1171_s23 }
 0x121   : > { %v580_v58 = vadd.f32 %v576_v32, %v560_v15  ;;  %v581_v59 = vadd.f32 %v577_v17, %v561_v50  ;;  %s1173_s5 = scalar_lea.vmem %s1172_s23, 512  ;;  %p1174_p9 = scmp.lt.s32.totalorder %s1859_s8, %s1172_s23 }
 0x122   : > { %p1175_p10 = scmp.lt.s32.totalorder %s1173_s5, %s1167_s17 }
 0x123   : > { %v604_v21 = vpop.permute.xlu0 %603  ;;  %v642_v22 = vpop.permute.xlu1 %641  ;;  %v601_v4 = vadd.f32 %v599_v0, %v580_v58  ;;  %v602_v5 = vadd.f32 %v600_v1, %v581_v59 }
 0x124   : > { %v609_v30 = vsel %vm273_vm6, %v604_v21, %v606_v20  ;;  %p1176_p2 = por %p1175_p10, %p1174_p9 }
 0x125   : > { %v613_v60 = vsel %vm1523_vm1, %v609_v30, 0.0 }
 0x126   : > { %v617_v2 = vmul.f32 %v616_v57, %v613_v60  ;;  %p1177_p0 = pnand %p1176_p2, %p1170_p8 }
 0x127   : > { %v608_v23 = vpop.permute.xlu0 %607  ;;  %v646_v24 = vpop.permute.xlu1 %645 }
 0x128   : > { %v610_v47 = vsel %vm273_vm6, %v606_v20, %v608_v23  ;;  %v619_v16 = vadd.f32 %v617_v2, %v601_v4 }
 0x129   : > { %v614_v61 = vsel %vm1527_vm2, %v610_v47, 0.0  ;;  %v710_v47 = vstv %s1781_s25 }
 0x12a   : > { %v618_v3 = vmul.f32 %v616_v57, %v614_v61 }
 0x12b   : > { %v644_v25 = vpop.permute.xlu0 %643  ;;  %v632_v26 = vpop.permute.xlu1 %631 }
 0x12c   : > { %v647_v8 = vsel %vm313_vm8, %v642_v22, %v644_v25  ;;  %v648_v9 = vsel %vm313_vm8, %v644_v25, %v646_v24  ;;  %v620_v18 = vadd.f32 %v618_v3, %v602_v5 }
 0x12d   : > { %v651_v20 = vsel %vm1536_vm3, %v647_v8, 0.0  ;;  %v652_v21 = vsel %vm1547_vm4, %v648_v9, 0.0  ;;  %v763_v9 = vstv %s1798_s3 }
 0x12f   : > { %v630_v27 = vpop.permute.xlu0 %629  ;;  %v660_v28 = vpop.permute.xlu1 %659 }
 0x130   : > { %v635_v12 = vsel %vm300_vm7, %v630_v27, %v632_v26 }
 0x133   : > { %v634_v29 = vpop.permute.xlu0 %633  ;;  %v664_v31 = vpop.permute.xlu1 %663 }
 0x134   : > { %v636_v13 = vsel %vm300_vm7, %v632_v26, %v634_v29  ;;  %v639_v26 = vadd.f32 %v635_v12, %v619_v16  ;;  %v656_v29 = vmul.f32 %v654_v14, %v652_v21  ;;  %v781_v12 = vstv %s1800_s4 }
 0x135   : > { %v640_v27 = vadd.f32 %v636_v13, %v620_v18 }
 0x137   : > { %v662_v33 = vpop.permute.xlu0 %661  ;;  %v1730_v35 = vpop.permute.xlu1 %699  ;;  %v658_v41 = vadd.f32 %v656_v29, %v640_v27 }
 0x138   : > { %v665_v10 = vsel %vm332_vm9, %v660_v28, %v662_v33  ;;  %v666_v11 = vsel %vm332_vm9, %v662_v33, %v664_v31  ;;  %v655_v28 = vmul.f32 %v654_v14, %v651_v20 }
 0x139   : > { %v669_v22 = vsel %vm1523_vm1, %v665_v10, 0.0  ;;  %v670_v23 = vsel %vm1527_vm2, %v666_v11, 0.0 }
 0x13a   : > { %v673_v31 = vmul.f32 %v672_v19, %v669_v22  ;;  %v674_v33 = vmul.f32 %v672_v19, %v670_v23  ;;  %v657_v37 = vadd.f32 %v655_v28, %v639_v26 }
 0x13b   : > { %v1740_v38 = vpop.permute.xlu0 %697  ;;  %v1742_v40 = vpop.permute.xlu1 %685 }
 0x13c   : > { %v703_v42 = vsel %vm372_vm11, %v1740_v38, %v1730_v35  ;;  %v675_v17 = vadd.f32 %v673_v31, %v657_v37  ;;  %v676_v30 = vadd.f32 %v674_v33, %v658_v41  ;;  %v819_v37 = vstv %s1039_s6 }
 0x13d   : > { %v707_v15 = vsel %vm1536_vm3, %v703_v42, 0.0 }
 0x13e   : > { %v711_v54 = vmul.f32 %v710_v47, %v707_v15 }
 0x13f   : > { %v702_v34 = vpop.permute.xlu0 %701  ;;  %v690_v46 = vpop.permute.xlu1 %689 }
 0x140   : > { %v704_v43 = vsel %vm372_vm11, %v1730_v35, %v702_v34  ;;  %v719_v34 = vsel %vm1523_vm1, %v1599_v45, 0.0 }
 0x141   : > { %v708_v50 = vsel %vm1547_vm4, %v704_v43, 0.0 }
 0x142   : > { %v712_v57 = vmul.f32 %v710_v47, %v708_v50 }
 0x143   : > { %v688_v62 = vpop.permute.xlu0 %687  ;;  %v1763_v63 = vpop.permute.xlu1 %752 }
 0x144   : > { %v691_v44 = vsel %vm359_vm10, %v1742_v40, %v688_v62  ;;  %v692_v32 = vsel %vm359_vm10, %v688_v62, %v690_v46  ;;  %v722_v40 = vstv %s1783_s29  ;;  %v720_v46 = vsel %vm1527_vm2, %v1592_v39, 0.0 }
 0x145   : > { %v695_v53 = vadd.f32 %v691_v44, %v675_v17  ;;  %v696_v35 = vadd.f32 %v692_v32, %v676_v30  ;;  %v723_v62 = vmul.f32 %v722_v40, %v719_v34  ;;  %v724_v0 = vmul.f32 %v722_v40, %v720_v46 }
 0x146   : > { %v837_v32 = vstv %s1827_s19 }
 0x147   : > { %v751_v6 = vpop.permute.xlu0 %750  ;;  %v736_v7 = vpop.permute.xlu1 %735  ;;  %v713_v60 = vadd.f32 %v711_v54, %v695_v53  ;;  %v714_v61 = vadd.f32 %v712_v57, %v696_v35 }
 0x148   : > { %v756_v1 = vsel %vm254_vm0, %v751_v6, %v1763_v63 }
 0x149   : > { %v725_v10 = vadd.f32 %v723_v62, %v713_v60  ;;  %v726_v11 = vadd.f32 %v724_v0, %v714_v61  ;;  %v760_v6 = vsel %vm1536_vm3, %v756_v1, 0.0 }
 0x14a   : > { %v764_v20 = vmul.f32 %v763_v9, %v760_v6 }
 0x14b   : > { %v755_v24 = vpop.permute.xlu0 %754  ;;  %v740_v25 = vpop.permute.xlu1 %739 }
 0x14c   : > { %v757_v45 = vsel %vm254_vm0, %v1763_v63, %v755_v24 }
 0x14d   : > { %v761_v63 = vsel %vm1547_vm4, %v757_v45, 0.0 }
 0x14e   : > { %v765_v21 = vmul.f32 %v763_v9, %v761_v63 }
 0x14f   : > { %v738_v55 = vpop.permute.xlu0 %737  ;;  %v771_v36 = vpop.permute.xlu1 %770 }
 0x150   : > { %v741_v3 = vsel %vm234_vm5, %v736_v7, %v738_v55  ;;  %v742_v4 = vsel %vm234_vm5, %v738_v55, %v740_v25 }
 0x151   : > { %v745_v14 = vadd.f32 %v741_v3, %v725_v10  ;;  %v746_v16 = vadd.f32 %v742_v4, %v726_v11 }
 0x153   : > { %v769_v38 = vpop.permute.xlu0 %768  ;;  %v807_v51 = vpop.permute.xlu1 %806  ;;  %v766_v24 = vadd.f32 %v764_v20, %v745_v14  ;;  %v767_v25 = vadd.f32 %v765_v21, %v746_v16 }
 0x154   : > { %v774_v2 = vsel %vm273_vm6, %v769_v38, %v771_v36 }
 0x155   : > { %v778_v13 = vsel %vm1523_vm1, %v774_v2, 0.0 }
 0x156   : > { %v782_v22 = vmul.f32 %v781_v12, %v778_v13 }
 0x157   : > { %v773_v58 = vpop.permute.xlu0 %772  ;;  %v811_v59 = vpop.permute.xlu1 %810 }
 0x158   : > { %v775_v39 = vsel %vm273_vm6, %v771_v36, %v773_v58  ;;  %v784_v33 = vadd.f32 %v782_v22, %v766_v24 }
 0x159   : > { %v779_v7 = vsel %vm1527_vm2, %v775_v39, 0.0 }
 0x15a   : > { %v783_v23 = vmul.f32 %v781_v12, %v779_v7 }
 0x15b   : > { %v809_v5 = vpop.permute.xlu0 %808  ;;  %v797_v8 = vpop.permute.xlu1 %796 }
 0x15c   : > { %v812_v26 = vsel %vm313_vm8, %v807_v51, %v809_v5  ;;  %v813_v27 = vsel %vm313_vm8, %v809_v5, %v811_v59  ;;  %v785_v55 = vadd.f32 %v783_v23, %v767_v25 }
 0x15d   : > { %v816_v41 = vsel %vm1536_vm3, %v812_v26, 0.0  ;;  %v817_v42 = vsel %vm1547_vm4, %v813_v27, 0.0 }
 0x15e   : > { %v820_v47 = vmul.f32 %v819_v37, %v816_v41  ;;  %v821_v15 = vmul.f32 %v819_v37, %v817_v42 }
 0x15f   : > { %v795_v18 = vpop.permute.xlu0 %794  ;;  %v825_v19 = vpop.permute.xlu1 %824 }
 0x160   : > { %v800_v28 = vsel %vm300_vm7, %v795_v18, %v797_v8 }
 0x161   : > { %v804_v43 = vadd.f32 %v800_v28, %v784_v33 }
 0x163   : > { %v799_v29 = vpop.permute.xlu0 %798  ;;  %v829_v31 = vpop.permute.xlu1 %828  ;;  %v822_v35 = vadd.f32 %v820_v47, %v804_v43 }
 0x164   : > { %v801_v36 = vsel %vm300_vm7, %v797_v8, %v799_v29 }
 0x165   : > { %v805_v44 = vadd.f32 %v801_v36, %v785_v55 }
 0x167   : > { %v827_v17 = vpop.permute.xlu0 %826  ;;  %v865_v30 = vpop.permute.xlu1 %864  ;;  %v823_v40 = vadd.f32 %v821_v15, %v805_v44 }
 0x168   : > { %v830_v50 = vsel %vm332_vm9, %v825_v19, %v827_v17  ;;  %v831_v38 = vsel %vm332_vm9, %v827_v17, %v829_v31 }
 0x169   : > { %v834_v51 = vsel %vm1523_vm1, %v830_v50, 0.0  ;;  %v835_v53 = vsel %vm1527_vm2, %v831_v38, 0.0 }
 0x16a   : > { %v838_v34 = vmul.f32 %v837_v32, %v834_v51  ;;  %v839_v46 = vmul.f32 %v837_v32, %v835_v53 }
 0x16b   : > { %v863_v54 = vpop.permute.xlu0 %862  ;;  %v851_v57 = vpop.permute.xlu1 %850 }
 0x16c   : > { %v840_v58 = vadd.f32 %v838_v34, %v822_v35  ;;  %v841_v59 = vadd.f32 %v839_v46, %v823_v40  ;;  %v868_v60 = vsel %vm372_vm11, %v863_v54, %v865_v30 }
 0x16d   : > { %v872_v49 = vsel %vm1536_vm3, %v868_v60, 0.0 }
 0x16e   : > { %v876_v3 = vmul.f32 %v875_v48, %v872_v49 }
 0x16f   : > { %v867_v61 = vpop.permute.xlu0 %866  ;;  %v855_v0 = vpop.permute.xlu1 %854 }
 0x170   : > { %v869_v62 = vsel %vm372_vm11, %v865_v30, %v867_v61 }
 0x171   : > { %v873_v1 = vsel %vm1547_vm4, %v869_v62, 0.0 }
 0x172   : > { %v877_v4 = vmul.f32 %v875_v48, %v873_v1 }
 0x173   : > { %v853_v45 = vpop.permute.xlu0 %852 }
 0x174   : > { %v856_v2 = vsel %vm359_vm10, %v851_v57, %v853_v45  ;;  %v857_v39 = vsel %vm359_vm10, %v853_v45, %v855_v0 }
 0x175   : > { %v860_v5 = vadd.f32 %v856_v2, %v840_v58  ;;  %v861_v8 = vadd.f32 %v857_v39, %v841_v59 }
 0x177   : > { %v878_v9 = vadd.f32 %v876_v3, %v860_v5  ;;  %v879_v10 = vadd.f32 %v877_v4, %v861_v8 }
 0x179   : > { %v880_v11 = vsub.f32 0.0, %v878_v9  ;;  %v881_v12 = vsub.f32 0.0, %v879_v10 }
 0x17b   : > { %v882_v52 = vmul.f32 1.442695, %v880_v11  ;;  %v884_v6 = vmul.f32 1.442695, %v881_v12 }
 0x17d   : > { %1120 = vpow2.f32 %v882_v52 }
 0x17e   : > { %1122 = vpow2.f32 %v884_v6 }
 0x18a   : > { %v1121_v56 = vpop.eup %1120 }
 0x18b   : > { %v1123_v63 = vpop.eup %1122  ;;  %v886_v13 = vadd.f32 1.0, %v1121_v56 }
 0x18c   : > { %v887_v7 = vadd.f32 1.0, %v1123_v63 }
 0x18d   : > { %1124 = vrcp.f32 %v886_v13 }
 0x18e   : > { %1126 = vrcp.f32 %v887_v7 }
 0x19a   : > { %v1125_v14 = vpop.eup %1124 }
 0x19b   : > { %v1127_v16 = vpop.eup %1126  ;;  %892 = vst [vmem:[%s173_s16] sm:$0xff] %v1125_v14 }
 0x19c   : > { %893 = vst [vmem:[%s173_s16 + $0x8] sm:$0xff] %v1127_v16 }
 0x19d   : > { %1180 = shalt.err (!%p1177_p0)
}
 0x19e   : > { %s1181_s25 = scalar_lea.hbm %s1857_s27, 256  ;;  %s1185_s3 = scalar_lea.hbm %s1902_s2, 512 }
 0x19f   : > { %p1182_p3 = scmp.ne.s32.totalorder %s1857_s27, %s1181_s25  ;;  %p1186_p4 = scmp.lt.s32.totalorder %s1857_s27, %s1902_s2 }
 0x1a0   : > { %p1187_p6 = scmp.lt.s32.totalorder %s1185_s3, %s1181_s25 }
 0x1a1   : > { %p1183_p5 = pnand %p1182_p3, %p1926_p13 }
 0x1a2   : > { %p1188_p11 = por %p1187_p6, %p1186_p4 }
 0x1a3   : > { %p1184_p1 = pneg %p1183_p5 }
 0x1a5   : > { %p1189_p12 = pnand %p1188_p11, %p1184_p1 }
 0x1a7   : > { %1192 = shalt.err (!%p1189_p12)
}
 0x1a8   : > { %1058 = dma.vmem_to_hbm [thread:$0]  (%p1926_p13), %s1859_s8, 256, %s1857_s27, %s895_s30  }
 0x1a9 PF: > { %s921_s19 = sand.u32 1, %s1223_s9   ;;  %p1927_p7 = scmp.ne.s32.totalorder %s1910_s22, 0 }
 0x1aa   : > { %p1928_p8 = scmp.ge.s32.totalorder %s1235_s12, 2  ;;  %s922_s26 = scalar_lea.sflag [#allocation4], %s921_s19 }
 0x1ac   : > { %p1069_p9 = pnand %p1928_p8, %p1927_p7 }
 0x1ae   : > { %p1070_p10 = pneg %p1069_p9 }
 0x1b0   : > { %1218 = dma.done.wait (%p1070_p10), %s922_s26, 256  }
 0x1b1   : > { %1220 = vsyncadd (%p1070_p10), %s922_s26, 4294967040  ;;  %p16_p2 = scmp.ge.s32.totalorder %s1291_s15, 4   ;;  %s1929_s9 = smov %s1227_s10 }
 0x1b2   : > { %s1930_s10 = smov %s1231_s11  ;;  %s1931_s11 = smov %s1303_s18 }
 0x1b3   : > { %s1932_s12 = smov %s1291_s15  ;;  %18 = sbr.rel (!%p16_p2) target bundleno = 6 (0x6), region = 81 }
 0x1b8   :  { %927 = vsyncpa [#allocation3], 1 }
 0x1b9   :  { %929 = vsyncpa [#allocation3 + $0x1], 1 }
 0x1ba   :  { %930 = vsyncpa [#allocation4], 1 }
 0x1bb   :  { %932 = vsyncpa [#allocation4 + $0x1], 1 }
 0x1bc   :  { %933 = vsyncpa [#allocation5], 1 }
 0x1bd   :  { %935 = vsyncpa [#allocation5 + $0x1], 1 }

</bundles_post_ra>
